<compile_context>
chip_gen: v6e
topology: v6e:2x2x1
jax: 0.10.0
libtpu: 0.0.40
codegen_flags: <defaults>
</compile_context>

<pallas_src>
import functools

import jax
import jax.numpy as jnp
from jax.experimental import pallas as pl
from jax.experimental.pallas import tpu as pltpu

_LN_EPS = 1e-5  # PyTorch nn.LayerNorm default


def _gelu_tanh(x):
    # tanh-approximate GELU (Mosaic-safe transcendental path).
    # TODO(synk): PyTorch nn.GELU() default is the exact erf form; tanh approx differs by ~1e-3.
    c = 0.7978845608028654  # sqrt(2/pi)
    return 0.5 * x * (1.0 + jnp.tanh(c * (x + 0.044715 * x * x * x)))


def _layernorm(v, w, b):
    mu = jnp.mean(v, axis=-1, keepdims=True)
    var = jnp.mean(jnp.square(v - mu), axis=-1, keepdims=True)
    return (v - mu) * jax.lax.rsqrt(var + _LN_EPS) * w + b


def _block_kernel(x_ref, pos_ref,
                  ln1w_ref, ln1b_ref,
                  qkvw_ref, qkvb_ref,
                  projw_ref, projb_ref,
                  ln2w_ref, ln2b_ref,
                  fc1w_ref, fc1b_ref,
                  fc2w_ref, fc2b_ref,
                  o_ref, *, num_heads, scale):
    # Per grid step: one batch element, view (N, C).
    xp = x_ref[0] + pos_ref[0]                      # fused `x + pos`
    n, c = xp.shape
    hd = c // num_heads

    # ---- attention branch ---------------------------------------------------
    xn = _layernorm(xp, ln1w_ref[...], ln1b_ref[...])
    qkv = jnp.dot(xn, qkvw_ref[...], preferred_element_type=jnp.float32) + qkvb_ref[...]
    q = qkv[:, 0:c]
    k = qkv[:, c:2 * c]
    v = qkv[:, 2 * c:3 * c]

    heads = []
    for h in range(num_heads):                      # static loop; tiny per-head GEMMs
        sl = slice(h * hd, (h + 1) * hd)
        qh = q[:, sl] * scale
        kh = k[:, sl]
        vh = v[:, sl]
        # q @ k^T via dot_general contracting dim 1 of both operands (no transpose op).
        s = jax.lax.dot_general(qh, kh, (((1,), (1,)), ((), ())),
                                preferred_element_type=jnp.float32)   # (N, N)
        s = s - jnp.max(s, axis=-1, keepdims=True)
        p = jnp.exp(s)
        p = p / jnp.sum(p, axis=-1, keepdims=True)
        heads.append(jnp.dot(p, vh, preferred_element_type=jnp.float32))
    attn_out = jnp.concatenate(heads, axis=-1)      # (N, C)

    attn = jnp.dot(attn_out, projw_ref[...],
                   preferred_element_type=jnp.float32) + projb_ref[...]
    x1 = xp + attn                                  # residual 1

    # ---- MLP branch ----------------------------------------------------------
    xn2 = _layernorm(x1, ln2w_ref[...], ln2b_ref[...])
    h1 = jnp.dot(xn2, fc1w_ref[...], preferred_element_type=jnp.float32) + fc1b_ref[...]
    h1 = _gelu_tanh(h1)
    h2 = jnp.dot(h1, fc2w_ref[...], preferred_element_type=jnp.float32) + fc2b_ref[...]

    o_ref[0] = (x1 + h2).astype(o_ref.dtype)        # residual 2


def _block_forward(x, pos, p, *, num_heads):
    B, N, C = x.shape
    H = p["fc1_wt"].shape[1]
    scale = (C // num_heads) ** (-0.5)
    kernel = functools.partial(_block_kernel, num_heads=num_heads, scale=scale)

    row = lambda b: (b, 0, 0)       # per-batch activation blocks
    full = lambda b: (0, 0)         # parameters: same block every step -> VMEM-resident

    return pl.pallas_call(
        kernel,
        out_shape=jax.ShapeDtypeStruct((B, N, C), x.dtype),
        grid=(B,),
        in_specs=[
            pl.BlockSpec((1, N, C), row),       # x
            pl.BlockSpec((1, N, C), row),       # pos
            pl.BlockSpec((1, C), full),         # ln1 weight
            pl.BlockSpec((1, C), full),         # ln1 bias
            pl.BlockSpec((C, 3 * C), full),     # qkv weight (pre-transposed: in x out)
            pl.BlockSpec((1, 3 * C), full),     # qkv bias (zeros when qkv_bias=False)
            pl.BlockSpec((C, C), full),         # proj weight (pre-transposed)
            pl.BlockSpec((1, C), full),         # proj bias
            pl.BlockSpec((1, C), full),         # ln2 weight
            pl.BlockSpec((1, C), full),         # ln2 bias
            pl.BlockSpec((C, H), full),         # fc1 weight (pre-transposed)
            pl.BlockSpec((1, H), full),         # fc1 bias
            pl.BlockSpec((H, C), full),         # fc2 weight (pre-transposed)
            pl.BlockSpec((1, C), full),         # fc2 bias
        ],
        out_specs=pl.BlockSpec((1, N, C), row),
        compiler_params=pltpu.CompilerParams(
            dimension_semantics=("parallel",)),  # batch tiles -> both TCs on v7x
    )(x, pos, p["ln1_w"], p["ln1_b"], p["qkv_wt"], p["qkv_b"],
      p["proj_wt"], p["proj_b"], p["ln2_w"], p["ln2_b"],
      p["fc1_wt"], p["fc1_b"], p["fc2_wt"], p["fc2_b"])


def _encoder_forward(x, pos, blocks, *, num_heads):
    # TransformerEncoder.forward: x = block(x + pos) for every block (pos re-added each time,
    # fused into the block kernel).
    for p in blocks:
        x = _block_forward(x, pos, p, num_heads=num_heads)
    return x


class TransformerEncoderPallas:
    """JAX/Pallas port of TransformerEncoder (eval mode: dropout / drop_path are identity)."""

    def __init__(self, embed_dim=32, depth=4, num_heads=4, mlp_ratio=4.0,
                 qkv_bias=False, key=None):
        if key is None:
            key = jax.random.PRNGKey(0)
        self.embed_dim = embed_dim
        self.num_heads = num_heads
        hidden = int(embed_dim * mlp_ratio)

        def linear(k, fan_in, fan_out, use_bias=True):
            kw, kb = jax.random.split(k)
            bound = 1.0 / (fan_in ** 0.5)
            # Stored pre-transposed (in, out): transpose done once here, never per call.
            wt = jax.random.uniform(kw, (fan_in, fan_out), jnp.float32, -bound, bound)
            if use_bias:
                b = jax.random.uniform(kb, (1, fan_out), jnp.float32, -bound, bound)
            else:
                b = jnp.zeros((1, fan_out), jnp.float32)
            return wt, b

        self.blocks = []
        for kb in jax.random.split(key, depth):
            k1, k2, k3, k4 = jax.random.split(kb, 4)
            qkv_wt, qkv_b = linear(k1, embed_dim, 3 * embed_dim, use_bias=qkv_bias)
            proj_wt, proj_b = linear(k2, embed_dim, embed_dim)
            fc1_wt, fc1_b = linear(k3, embed_dim, hidden)
            fc2_wt, fc2_b = linear(k4, hidden, embed_dim)
            self.blocks.append(dict(
                ln1_w=jnp.ones((1, embed_dim), jnp.float32),
                ln1_b=jnp.zeros((1, embed_dim), jnp.float32),
                qkv_wt=qkv_wt, qkv_b=qkv_b,
                proj_wt=proj_wt, proj_b=proj_b,
                ln2_w=jnp.ones((1, embed_dim), jnp.float32),
                ln2_b=jnp.zeros((1, embed_dim), jnp.float32),
                fc1_wt=fc1_wt, fc1_b=fc1_b,
                fc2_wt=fc2_wt, fc2_b=fc2_b,
            ))

        self._fwd = jax.jit(functools.partial(_encoder_forward, num_heads=num_heads))

    def __call__(self, x, pos):
        return self._fwd(x, pos, self.blocks)


def _reference_forward(x, pos, blocks, num_heads):
    """Pure-JAX reference of the same forward (HIGHEST precision matmuls)."""
    P = jax.lax.Precision.HIGHEST
    B, N, C = x.shape
    hd = C // num_heads
    scale = hd ** (-0.5)
    for p in blocks:
        xp = x + pos
        xn = _layernorm(xp, p["ln1_w"], p["ln1_b"])
        qkv = jnp.einsum("bnc,cd->bnd", xn, p["qkv_wt"], precision=P) + p["qkv_b"]
        q, k, v = jnp.split(qkv, 3, axis=-1)
        q = q.reshape(B, N, num_heads, hd) * scale
        k = k.reshape(B, N, num_heads, hd)
        v = v.reshape(B, N, num_heads, hd)
        s = jnp.einsum("bqhd,bkhd->bhqk", q, k, precision=P)
        a = jax.nn.softmax(s, axis=-1)
        o = jnp.einsum("bhqk,bkhd->bqhd", a, v, precision=P).reshape(B, N, C)
        attn = jnp.einsum("bnc,cd->bnd", o, p["proj_wt"], precision=P) + p["proj_b"]
        x1 = xp + attn
        xn2 = _layernorm(x1, p["ln2_w"], p["ln2_b"])
        h1 = _gelu_tanh(jnp.einsum("bnc,ch->bnh", xn2, p["fc1_wt"], precision=P) + p["fc1_b"])
        h2 = jnp.einsum("bnh,hc->bnc", h1, p["fc2_wt"], precision=P) + p["fc2_b"]
        x = x1 + h2
    return x


if __name__ == "__main__":
    key = jax.random.PRNGKey(0)
    k_x, k_pos, k_params = jax.random.split(key, 3)

    B, N, C = 2, 16, 32          # batch, seq, embed_dim (small, consistent with the module)
    depth, num_heads = 2, 4      # head_dim = 8, mlp hidden = 128

    x = jax.random.normal(k_x, (B, N, C), jnp.float32)
    pos = jax.random.normal(k_pos, (B, N, C), jnp.float32)

    enc = TransformerEncoderPallas(embed_dim=C, depth=depth, num_heads=num_heads,
                                   mlp_ratio=4.0, qkv_bias=False, key=k_params)
    out = jax.block_until_ready(enc(x, pos))

    ref = _reference_forward(x, pos, enc.blocks, num_heads)
    assert out.shape == (B, N, C), out.shape
    # Generous tolerance: kernel accumulates in f32, but MXU f32 pass structure may differ
    # slightly from the HIGHEST-precision XLA reference.
    assert jnp.allclose(out, ref, atol=2e-2, rtol=2e-2), float(jnp.max(jnp.abs(out - ref)))

    print("KERNEL_OK")
</pallas_src>

<mosaic_0001>
module attributes {stable_mosaic.version = 11 : i64} {
  func.func @_block_kernel(%arg0: i32, %arg1: memref<1x16x32xf32, #tpu.memory_space<vmem>>, %arg2: memref<1x16x32xf32, #tpu.memory_space<vmem>>, %arg3: memref<1x32xf32, #tpu.memory_space<vmem>>, %arg4: memref<1x32xf32, #tpu.memory_space<vmem>>, %arg5: memref<32x96xf32, #tpu.memory_space<vmem>>, %arg6: memref<1x96xf32, #tpu.memory_space<vmem>>, %arg7: memref<32x32xf32, #tpu.memory_space<vmem>>, %arg8: memref<1x32xf32, #tpu.memory_space<vmem>>, %arg9: memref<1x32xf32, #tpu.memory_space<vmem>>, %arg10: memref<1x32xf32, #tpu.memory_space<vmem>>, %arg11: memref<32x128xf32, #tpu.memory_space<vmem>>, %arg12: memref<1x128xf32, #tpu.memory_space<vmem>>, %arg13: memref<128x32xf32, #tpu.memory_space<vmem>>, %arg14: memref<1x32xf32, #tpu.memory_space<vmem>>, %arg15: memref<1x16x32xf32, #tpu.memory_space<vmem>>) attributes {dimension_semantics = [#tpu.dimension_semantics<parallel>], iteration_bounds = array<i64: 2>, scalar_prefetch = 0 : i64, scratch_operands = 0 : i64, tpu.core_type = #tpu.core_type<tc>, window_params = [{transform_indices = @transform_0, window_bounds = array<i64: 1, 16, 32>}, {transform_indices = @transform_1, window_bounds = array<i64: 1, 16, 32>}, {pipeline_mode = #tpu.pipeline_mode<synchronous>, transform_indices = @transform_2, window_bounds = array<i64: 1, 32>}, {pipeline_mode = #tpu.pipeline_mode<synchronous>, transform_indices = @transform_3, window_bounds = array<i64: 1, 32>}, {pipeline_mode = #tpu.pipeline_mode<synchronous>, transform_indices = @transform_4, window_bounds = array<i64: 32, 96>}, {pipeline_mode = #tpu.pipeline_mode<synchronous>, transform_indices = @transform_5, window_bounds = array<i64: 1, 96>}, {pipeline_mode = #tpu.pipeline_mode<synchronous>, transform_indices = @transform_6, window_bounds = array<i64: 32, 32>}, {pipeline_mode = #tpu.pipeline_mode<synchronous>, transform_indices = @transform_7, window_bounds = array<i64: 1, 32>}, {pipeline_mode = #tpu.pipeline_mode<synchronous>, transform_indices = @transform_8, window_bounds = array<i64: 1, 32>}, {pipeline_mode = #tpu.pipeline_mode<synchronous>, transform_indices = @transform_9, window_bounds = array<i64: 1, 32>}, {pipeline_mode = #tpu.pipeline_mode<synchronous>, transform_indices = @transform_10, window_bounds = array<i64: 32, 128>}, {pipeline_mode = #tpu.pipeline_mode<synchronous>, transform_indices = @transform_11, window_bounds = array<i64: 1, 128>}, {pipeline_mode = #tpu.pipeline_mode<synchronous>, transform_indices = @transform_12, window_bounds = array<i64: 128, 32>}, {pipeline_mode = #tpu.pipeline_mode<synchronous>, transform_indices = @transform_13, window_bounds = array<i64: 1, 32>}, {transform_indices = @transform_14, window_bounds = array<i64: 1, 16, 32>}]} {
    %c0 = arith.constant 0 : index
    %c0_0 = arith.constant 0 : index
    %c0_1 = arith.constant 0 : index
    %0 = vector.load %arg1[%c0, %c0_0, %c0_1] : memref<1x16x32xf32, #tpu.memory_space<vmem>>, vector<1x16x32xf32>
    %1 = vector.shape_cast %0 : vector<1x16x32xf32> to vector<16x32xf32>
    %c0_2 = arith.constant 0 : index
    %c0_3 = arith.constant 0 : index
    %c0_4 = arith.constant 0 : index
    %2 = vector.load %arg2[%c0_2, %c0_3, %c0_4] : memref<1x16x32xf32, #tpu.memory_space<vmem>>, vector<1x16x32xf32>
    %3 = vector.shape_cast %2 : vector<1x16x32xf32> to vector<16x32xf32>
    %4 = arith.addf %1, %3 : vector<16x32xf32>
    %c0_5 = arith.constant 0 : index
    %c0_6 = arith.constant 0 : index
    %5 = vector.load %arg3[%c0_5, %c0_6] : memref<1x32xf32, #tpu.memory_space<vmem>>, vector<1x32xf32>
    %c0_7 = arith.constant 0 : index
    %c0_8 = arith.constant 0 : index
    %6 = vector.load %arg4[%c0_7, %c0_8] : memref<1x32xf32, #tpu.memory_space<vmem>>, vector<1x32xf32>
    %cst = arith.constant dense<0.000000e+00> : vector<16xf32>
    %7 = vector.multi_reduction <add>, %4, %cst [1] : vector<16x32xf32> to vector<16xf32>
    %8 = vector.shape_cast %7 : vector<16xf32> to vector<16x1xf32>
    %cst_9 = arith.constant 3.200000e+01 : f32
    %9 = vector.broadcast %cst_9 : f32 to vector<16x1xf32>
    %10 = arith.divf %8, %9 : vector<16x1xf32>
    %11 = vector.broadcast %10 : vector<16x1xf32> to vector<16x32xf32>
    %12 = arith.subf %4, %11 : vector<16x32xf32>
    %13 = arith.mulf %12, %12 : vector<16x32xf32>
    %cst_10 = arith.constant dense<0.000000e+00> : vector<16xf32>
    %14 = vector.multi_reduction <add>, %13, %cst_10 [1] : vector<16x32xf32> to vector<16xf32>
    %15 = vector.shape_cast %14 : vector<16xf32> to vector<16x1xf32>
    %cst_11 = arith.constant 3.200000e+01 : f32
    %16 = vector.broadcast %cst_11 : f32 to vector<16x1xf32>
    %17 = arith.divf %15, %16 : vector<16x1xf32>
    %18 = vector.broadcast %10 : vector<16x1xf32> to vector<16x32xf32>
    %19 = arith.subf %4, %18 : vector<16x32xf32>
    %cst_12 = arith.constant 9.99999974E-6 : f32
    %20 = vector.broadcast %cst_12 : f32 to vector<16x1xf32>
    %21 = arith.addf %17, %20 : vector<16x1xf32>
    %22 = math.rsqrt %21 : vector<16x1xf32>
    %23 = vector.broadcast %22 : vector<16x1xf32> to vector<16x32xf32>
    %24 = arith.mulf %19, %23 : vector<16x32xf32>
    %25 = vector.broadcast %5 : vector<1x32xf32> to vector<16x32xf32>
    %26 = arith.mulf %24, %25 : vector<16x32xf32>
    %27 = vector.broadcast %6 : vector<1x32xf32> to vector<16x32xf32>
    %28 = arith.addf %26, %27 : vector<16x32xf32>
    %c0_13 = arith.constant 0 : index
    %c0_14 = arith.constant 0 : index
    %29 = vector.load %arg5[%c0_13, %c0_14] : memref<32x96xf32, #tpu.memory_space<vmem>>, vector<32x96xf32>
    %cst_15 = arith.constant dense<0.000000e+00> : vector<16x96xf32>
    %30 = tpu.matmul %28, %29, %cst_15 {dimension_numbers = #tpu.dot_dimension_numbers<[1], [0], [0], [1], [0, 0, 1, 1], [], []>} : vector<16x32xf32>, vector<32x96xf32>, vector<16x96xf32> -> vector<16x96xf32>
    %c0_16 = arith.constant 0 : index
    %c0_17 = arith.constant 0 : index
    %31 = vector.load %arg6[%c0_16, %c0_17] : memref<1x96xf32, #tpu.memory_space<vmem>>, vector<1x96xf32>
    %32 = vector.broadcast %31 : vector<1x96xf32> to vector<16x96xf32>
    %33 = arith.addf %30, %32 : vector<16x96xf32>
    %34 = vector.extract_strided_slice %33 {offsets = [0, 0], sizes = [16, 32], strides = [1, 1]} : vector<16x96xf32> to vector<16x32xf32>
    %35 = vector.extract_strided_slice %33 {offsets = [0, 32], sizes = [16, 32], strides = [1, 1]} : vector<16x96xf32> to vector<16x32xf32>
    %36 = vector.extract_strided_slice %33 {offsets = [0, 64], sizes = [16, 32], strides = [1, 1]} : vector<16x96xf32> to vector<16x32xf32>
    %37 = vector.extract_strided_slice %34 {offsets = [0, 0], sizes = [16, 8], strides = [1, 1]} : vector<16x32xf32> to vector<16x8xf32>
    %cst_18 = arith.constant 0.353553385 : f32
    %38 = vector.broadcast %cst_18 : f32 to vector<16x8xf32>
    %39 = arith.mulf %37, %38 : vector<16x8xf32>
    %40 = vector.extract_strided_slice %35 {offsets = [0, 0], sizes = [16, 8], strides = [1, 1]} : vector<16x32xf32> to vector<16x8xf32>
    %41 = vector.extract_strided_slice %36 {offsets = [0, 0], sizes = [16, 8], strides = [1, 1]} : vector<16x32xf32> to vector<16x8xf32>
    %cst_19 = arith.constant dense<0.000000e+00> : vector<16x16xf32>
    %42 = tpu.matmul %39, %40, %cst_19 {dimension_numbers = #tpu.dot_dimension_numbers<[1], [1], [0], [0], [0, 0, 1, 0], [], []>} : vector<16x8xf32>, vector<16x8xf32>, vector<16x16xf32> -> vector<16x16xf32>
    %cst_20 = arith.constant dense<0xFF800000> : vector<16xf32>
    %43 = vector.multi_reduction <maximumf>, %42, %cst_20 [1] : vector<16x16xf32> to vector<16xf32>
    %44 = vector.shape_cast %43 : vector<16xf32> to vector<16x1xf32>
    %45 = vector.broadcast %44 : vector<16x1xf32> to vector<16x16xf32>
    %46 = arith.subf %42, %45 : vector<16x16xf32>
    %47 = math.exp %46 : vector<16x16xf32>
    %cst_21 = arith.constant dense<0.000000e+00> : vector<16xf32>
    %48 = vector.multi_reduction <add>, %47, %cst_21 [1] : vector<16x16xf32> to vector<16xf32>
    %49 = vector.shape_cast %48 : vector<16xf32> to vector<16x1xf32>
    %50 = vector.broadcast %49 : vector<16x1xf32> to vector<16x16xf32>
    %51 = arith.divf %47, %50 : vector<16x16xf32>
    %cst_22 = arith.constant dense<0.000000e+00> : vector<16x8xf32>
    %52 = tpu.matmul %51, %41, %cst_22 {dimension_numbers = #tpu.dot_dimension_numbers<[1], [0], [0], [1], [0, 0, 1, 1], [], []>} : vector<16x16xf32>, vector<16x8xf32>, vector<16x8xf32> -> vector<16x8xf32>
    %53 = vector.extract_strided_slice %34 {offsets = [0, 8], sizes = [16, 8], strides = [1, 1]} : vector<16x32xf32> to vector<16x8xf32>
    %cst_23 = arith.constant 0.353553385 : f32
    %54 = vector.broadcast %cst_23 : f32 to vector<16x8xf32>
    %55 = arith.mulf %53, %54 : vector<16x8xf32>
    %56 = vector.extract_strided_slice %35 {offsets = [0, 8], sizes = [16, 8], strides = [1, 1]} : vector<16x32xf32> to vector<16x8xf32>
    %57 = vector.extract_strided_slice %36 {offsets = [0, 8], sizes = [16, 8], strides = [1, 1]} : vector<16x32xf32> to vector<16x8xf32>
    %cst_24 = arith.constant dense<0.000000e+00> : vector<16x16xf32>
    %58 = tpu.matmul %55, %56, %cst_24 {dimension_numbers = #tpu.dot_dimension_numbers<[1], [1], [0], [0], [0, 0, 1, 0], [], []>} : vector<16x8xf32>, vector<16x8xf32>, vector<16x16xf32> -> vector<16x16xf32>
    %cst_25 = arith.constant dense<0xFF800000> : vector<16xf32>
    %59 = vector.multi_reduction <maximumf>, %58, %cst_25 [1] : vector<16x16xf32> to vector<16xf32>
    %60 = vector.shape_cast %59 : vector<16xf32> to vector<16x1xf32>
    %61 = vector.broadcast %60 : vector<16x1xf32> to vector<16x16xf32>
    %62 = arith.subf %58, %61 : vector<16x16xf32>
    %63 = math.exp %62 : vector<16x16xf32>
    %cst_26 = arith.constant dense<0.000000e+00> : vector<16xf32>
    %64 = vector.multi_reduction <add>, %63, %cst_26 [1] : vector<16x16xf32> to vector<16xf32>
    %65 = vector.shape_cast %64 : vector<16xf32> to vector<16x1xf32>
    %66 = vector.broadcast %65 : vector<16x1xf32> to vector<16x16xf32>
    %67 = arith.divf %63, %66 : vector<16x16xf32>
    %cst_27 = arith.constant dense<0.000000e+00> : vector<16x8xf32>
    %68 = tpu.matmul %67, %57, %cst_27 {dimension_numbers = #tpu.dot_dimension_numbers<[1], [0], [0], [1], [0, 0, 1, 1], [], []>} : vector<16x16xf32>, vector<16x8xf32>, vector<16x8xf32> -> vector<16x8xf32>
    %69 = vector.extract_strided_slice %34 {offsets = [0, 16], sizes = [16, 8], strides = [1, 1]} : vector<16x32xf32> to vector<16x8xf32>
    %cst_28 = arith.constant 0.353553385 : f32
    %70 = vector.broadcast %cst_28 : f32 to vector<16x8xf32>
    %71 = arith.mulf %69, %70 : vector<16x8xf32>
    %72 = vector.extract_strided_slice %35 {offsets = [0, 16], sizes = [16, 8], strides = [1, 1]} : vector<16x32xf32> to vector<16x8xf32>
    %73 = vector.extract_strided_slice %36 {offsets = [0, 16], sizes = [16, 8], strides = [1, 1]} : vector<16x32xf32> to vector<16x8xf32>
    %cst_29 = arith.constant dense<0.000000e+00> : vector<16x16xf32>
    %74 = tpu.matmul %71, %72, %cst_29 {dimension_numbers = #tpu.dot_dimension_numbers<[1], [1], [0], [0], [0, 0, 1, 0], [], []>} : vector<16x8xf32>, vector<16x8xf32>, vector<16x16xf32> -> vector<16x16xf32>
    %cst_30 = arith.constant dense<0xFF800000> : vector<16xf32>
    %75 = vector.multi_reduction <maximumf>, %74, %cst_30 [1] : vector<16x16xf32> to vector<16xf32>
    %76 = vector.shape_cast %75 : vector<16xf32> to vector<16x1xf32>
    %77 = vector.broadcast %76 : vector<16x1xf32> to vector<16x16xf32>
    %78 = arith.subf %74, %77 : vector<16x16xf32>
    %79 = math.exp %78 : vector<16x16xf32>
    %cst_31 = arith.constant dense<0.000000e+00> : vector<16xf32>
    %80 = vector.multi_reduction <add>, %79, %cst_31 [1] : vector<16x16xf32> to vector<16xf32>
    %81 = vector.shape_cast %80 : vector<16xf32> to vector<16x1xf32>
    %82 = vector.broadcast %81 : vector<16x1xf32> to vector<16x16xf32>
    %83 = arith.divf %79, %82 : vector<16x16xf32>
    %cst_32 = arith.constant dense<0.000000e+00> : vector<16x8xf32>
    %84 = tpu.matmul %83, %73, %cst_32 {dimension_numbers = #tpu.dot_dimension_numbers<[1], [0], [0], [1], [0, 0, 1, 1], [], []>} : vector<16x16xf32>, vector<16x8xf32>, vector<16x8xf32> -> vector<16x8xf32>
    %85 = vector.extract_strided_slice %34 {offsets = [0, 24], sizes = [16, 8], strides = [1, 1]} : vector<16x32xf32> to vector<16x8xf32>
    %cst_33 = arith.constant 0.353553385 : f32
    %86 = vector.broadcast %cst_33 : f32 to vector<16x8xf32>
    %87 = arith.mulf %85, %86 : vector<16x8xf32>
    %88 = vector.extract_strided_slice %35 {offsets = [0, 24], sizes = [16, 8], strides = [1, 1]} : vector<16x32xf32> to vector<16x8xf32>
    %89 = vector.extract_strided_slice %36 {offsets = [0, 24], sizes = [16, 8], strides = [1, 1]} : vector<16x32xf32> to vector<16x8xf32>
    %cst_34 = arith.constant dense<0.000000e+00> : vector<16x16xf32>
    %90 = tpu.matmul %87, %88, %cst_34 {dimension_numbers = #tpu.dot_dimension_numbers<[1], [1], [0], [0], [0, 0, 1, 0], [], []>} : vector<16x8xf32>, vector<16x8xf32>, vector<16x16xf32> -> vector<16x16xf32>
    %cst_35 = arith.constant dense<0xFF800000> : vector<16xf32>
    %91 = vector.multi_reduction <maximumf>, %90, %cst_35 [1] : vector<16x16xf32> to vector<16xf32>
    %92 = vector.shape_cast %91 : vector<16xf32> to vector<16x1xf32>
    %93 = vector.broadcast %92 : vector<16x1xf32> to vector<16x16xf32>
    %94 = arith.subf %90, %93 : vector<16x16xf32>
    %95 = math.exp %94 : vector<16x16xf32>
    %cst_36 = arith.constant dense<0.000000e+00> : vector<16xf32>
    %96 = vector.multi_reduction <add>, %95, %cst_36 [1] : vector<16x16xf32> to vector<16xf32>
    %97 = vector.shape_cast %96 : vector<16xf32> to vector<16x1xf32>
    %98 = vector.broadcast %97 : vector<16x1xf32> to vector<16x16xf32>
    %99 = arith.divf %95, %98 : vector<16x16xf32>
    %cst_37 = arith.constant dense<0.000000e+00> : vector<16x8xf32>
    %100 = tpu.matmul %99, %89, %cst_37 {dimension_numbers = #tpu.dot_dimension_numbers<[1], [0], [0], [1], [0, 0, 1, 1], [], []>} : vector<16x16xf32>, vector<16x8xf32>, vector<16x8xf32> -> vector<16x8xf32>
    %101 = tpu.concatenate %52, %68, %84, %100 in 1 : vector<16x8xf32>, vector<16x8xf32>, vector<16x8xf32>, vector<16x8xf32> -> vector<16x32xf32>
    %c0_38 = arith.constant 0 : index
    %c0_39 = arith.constant 0 : index
    %102 = vector.load %arg7[%c0_38, %c0_39] : memref<32x32xf32, #tpu.memory_space<vmem>>, vector<32x32xf32>
    %cst_40 = arith.constant dense<0.000000e+00> : vector<16x32xf32>
    %103 = tpu.matmul %101, %102, %cst_40 {dimension_numbers = #tpu.dot_dimension_numbers<[1], [0], [0], [1], [0, 0, 1, 1], [], []>} : vector<16x32xf32>, vector<32x32xf32>, vector<16x32xf32> -> vector<16x32xf32>
    %c0_41 = arith.constant 0 : index
    %c0_42 = arith.constant 0 : index
    %104 = vector.load %arg8[%c0_41, %c0_42] : memref<1x32xf32, #tpu.memory_space<vmem>>, vector<1x32xf32>
    %105 = vector.broadcast %104 : vector<1x32xf32> to vector<16x32xf32>
    %106 = arith.addf %103, %105 : vector<16x32xf32>
    %107 = arith.addf %4, %106 : vector<16x32xf32>
    %c0_43 = arith.constant 0 : index
    %c0_44 = arith.constant 0 : index
    %108 = vector.load %arg9[%c0_43, %c0_44] : memref<1x32xf32, #tpu.memory_space<vmem>>, vector<1x32xf32>
    %c0_45 = arith.constant 0 : index
    %c0_46 = arith.constant 0 : index
    %109 = vector.load %arg10[%c0_45, %c0_46] : memref<1x32xf32, #tpu.memory_space<vmem>>, vector<1x32xf32>
    %cst_47 = arith.constant dense<0.000000e+00> : vector<16xf32>
    %110 = vector.multi_reduction <add>, %107, %cst_47 [1] : vector<16x32xf32> to vector<16xf32>
    %111 = vector.shape_cast %110 : vector<16xf32> to vector<16x1xf32>
    %cst_48 = arith.constant 3.200000e+01 : f32
    %112 = vector.broadcast %cst_48 : f32 to vector<16x1xf32>
    %113 = arith.divf %111, %112 : vector<16x1xf32>
    %114 = vector.broadcast %113 : vector<16x1xf32> to vector<16x32xf32>
    %115 = arith.subf %107, %114 : vector<16x32xf32>
    %116 = arith.mulf %115, %115 : vector<16x32xf32>
    %cst_49 = arith.constant dense<0.000000e+00> : vector<16xf32>
    %117 = vector.multi_reduction <add>, %116, %cst_49 [1] : vector<16x32xf32> to vector<16xf32>
    %118 = vector.shape_cast %117 : vector<16xf32> to vector<16x1xf32>
    %cst_50 = arith.constant 3.200000e+01 : f32
    %119 = vector.broadcast %cst_50 : f32 to vector<16x1xf32>
    %120 = arith.divf %118, %119 : vector<16x1xf32>
    %121 = vector.broadcast %113 : vector<16x1xf32> to vector<16x32xf32>
    %122 = arith.subf %107, %121 : vector<16x32xf32>
    %cst_51 = arith.constant 9.99999974E-6 : f32
    %123 = vector.broadcast %cst_51 : f32 to vector<16x1xf32>
    %124 = arith.addf %120, %123 : vector<16x1xf32>
    %125 = math.rsqrt %124 : vector<16x1xf32>
    %126 = vector.broadcast %125 : vector<16x1xf32> to vector<16x32xf32>
    %127 = arith.mulf %122, %126 : vector<16x32xf32>
    %128 = vector.broadcast %108 : vector<1x32xf32> to vector<16x32xf32>
    %129 = arith.mulf %127, %128 : vector<16x32xf32>
    %130 = vector.broadcast %109 : vector<1x32xf32> to vector<16x32xf32>
    %131 = arith.addf %129, %130 : vector<16x32xf32>
    %c0_52 = arith.constant 0 : index
    %c0_53 = arith.constant 0 : index
    %132 = vector.load %arg11[%c0_52, %c0_53] : memref<32x128xf32, #tpu.memory_space<vmem>>, vector<32x128xf32>
    %cst_54 = arith.constant dense<0.000000e+00> : vector<16x128xf32>
    %133 = tpu.matmul %131, %132, %cst_54 {dimension_numbers = #tpu.dot_dimension_numbers<[1], [0], [0], [1], [0, 0, 1, 1], [], []>} : vector<16x32xf32>, vector<32x128xf32>, vector<16x128xf32> -> vector<16x128xf32>
    %c0_55 = arith.constant 0 : index
    %c0_56 = arith.constant 0 : index
    %134 = vector.load %arg12[%c0_55, %c0_56] : memref<1x128xf32, #tpu.memory_space<vmem>>, vector<1x128xf32>
    %135 = vector.broadcast %134 : vector<1x128xf32> to vector<16x128xf32>
    %136 = arith.addf %133, %135 : vector<16x128xf32>
    %cst_57 = arith.constant 5.000000e-01 : f32
    %137 = vector.broadcast %cst_57 : f32 to vector<16x128xf32>
    %138 = arith.mulf %137, %136 : vector<16x128xf32>
    %cst_58 = arith.constant 4.471500e-02 : f32
    %139 = vector.broadcast %cst_58 : f32 to vector<16x128xf32>
    %140 = arith.mulf %139, %136 : vector<16x128xf32>
    %141 = arith.mulf %140, %136 : vector<16x128xf32>
    %142 = arith.mulf %141, %136 : vector<16x128xf32>
    %143 = arith.addf %136, %142 : vector<16x128xf32>
    %cst_59 = arith.constant 0.797884583 : f32
    %144 = vector.broadcast %cst_59 : f32 to vector<16x128xf32>
    %145 = arith.mulf %144, %143 : vector<16x128xf32>
    %146 = math.tanh %145 : vector<16x128xf32>
    %cst_60 = arith.constant 1.000000e+00 : f32
    %147 = vector.broadcast %cst_60 : f32 to vector<16x128xf32>
    %148 = arith.addf %147, %146 : vector<16x128xf32>
    %149 = arith.mulf %138, %148 : vector<16x128xf32>
    %c0_61 = arith.constant 0 : index
    %c0_62 = arith.constant 0 : index
    %150 = vector.load %arg13[%c0_61, %c0_62] : memref<128x32xf32, #tpu.memory_space<vmem>>, vector<128x32xf32>
    %cst_63 = arith.constant dense<0.000000e+00> : vector<16x32xf32>
    %151 = tpu.matmul %149, %150, %cst_63 {dimension_numbers = #tpu.dot_dimension_numbers<[1], [0], [0], [1], [0, 0, 1, 1], [], []>} : vector<16x128xf32>, vector<128x32xf32>, vector<16x32xf32> -> vector<16x32xf32>
    %c0_64 = arith.constant 0 : index
    %c0_65 = arith.constant 0 : index
    %152 = vector.load %arg14[%c0_64, %c0_65] : memref<1x32xf32, #tpu.memory_space<vmem>>, vector<1x32xf32>
    %153 = vector.broadcast %152 : vector<1x32xf32> to vector<16x32xf32>
    %154 = arith.addf %151, %153 : vector<16x32xf32>
    %155 = arith.addf %107, %154 : vector<16x32xf32>
    %c0_66 = arith.constant 0 : index
    %c0_67 = arith.constant 0 : index
    %c0_68 = arith.constant 0 : index
    %156 = vector.load %arg15[%c0_66, %c0_67, %c0_68] : memref<1x16x32xf32, #tpu.memory_space<vmem>>, vector<1x16x32xf32>
    %157 = vector.shape_cast %156 : vector<1x16x32xf32> to vector<16x32xf32>
    %158 = vector.shape_cast %155 : vector<16x32xf32> to vector<1x16x32xf32>
    tpu.vector_store %arg15[%c0_66, %c0_67, %c0_68], %158 {strides = array<i32>} : memref<1x16x32xf32, #tpu.memory_space<vmem>>, vector<1x16x32xf32>,
    return
  }
  func.func @transform_0(%arg0: i32) -> (i32, i32, i32) {
    %c0_i32 = arith.constant 0 : i32
    %c0_i32_0 = arith.constant 0 : i32
    %c0_i32_1 = arith.constant 0 : i32
    return %arg0, %c0_i32, %c0_i32_0 : i32, i32, i32
  }
  func.func @transform_1(%arg0: i32) -> (i32, i32, i32) {
    %c0_i32 = arith.constant 0 : i32
    %c0_i32_0 = arith.constant 0 : i32
    %c0_i32_1 = arith.constant 0 : i32
    return %arg0, %c0_i32, %c0_i32_0 : i32, i32, i32
  }
  func.func @transform_2(%arg0: i32) -> (i32, i32) {
    %c0_i32 = arith.constant 0 : i32
    %c0_i32_0 = arith.constant 0 : i32
    %c0_i32_1 = arith.constant 0 : i32
    return %c0_i32, %c0_i32_0 : i32, i32
  }
  func.func @transform_3(%arg0: i32) -> (i32, i32) {
    %c0_i32 = arith.constant 0 : i32
    %c0_i32_0 = arith.constant 0 : i32
    %c0_i32_1 = arith.constant 0 : i32
    return %c0_i32, %c0_i32_0 : i32, i32
  }
  func.func @transform_4(%arg0: i32) -> (i32, i32) {
    %c0_i32 = arith.constant 0 : i32
    %c0_i32_0 = arith.constant 0 : i32
    %c0_i32_1 = arith.constant 0 : i32
    return %c0_i32, %c0_i32_0 : i32, i32
  }
  func.func @transform_5(%arg0: i32) -> (i32, i32) {
    %c0_i32 = arith.constant 0 : i32
    %c0_i32_0 = arith.constant 0 : i32
    %c0_i32_1 = arith.constant 0 : i32
    return %c0_i32, %c0_i32_0 : i32, i32
  }
  func.func @transform_6(%arg0: i32) -> (i32, i32) {
    %c0_i32 = arith.constant 0 : i32
    %c0_i32_0 = arith.constant 0 : i32
    %c0_i32_1 = arith.constant 0 : i32
    return %c0_i32, %c0_i32_0 : i32, i32
  }
  func.func @transform_7(%arg0: i32) -> (i32, i32) {
    %c0_i32 = arith.constant 0 : i32
    %c0_i32_0 = arith.constant 0 : i32
    %c0_i32_1 = arith.constant 0 : i32
    return %c0_i32, %c0_i32_0 : i32, i32
  }
  func.func @transform_8(%arg0: i32) -> (i32, i32) {
    %c0_i32 = arith.constant 0 : i32
    %c0_i32_0 = arith.constant 0 : i32
    %c0_i32_1 = arith.constant 0 : i32
    return %c0_i32, %c0_i32_0 : i32, i32
  }
  func.func @transform_9(%arg0: i32) -> (i32, i32) {
    %c0_i32 = arith.constant 0 : i32
    %c0_i32_0 = arith.constant 0 : i32
    %c0_i32_1 = arith.constant 0 : i32
    return %c0_i32, %c0_i32_0 : i32, i32
  }
  func.func @transform_10(%arg0: i32) -> (i32, i32) {
    %c0_i32 = arith.constant 0 : i32
    %c0_i32_0 = arith.constant 0 : i32
    %c0_i32_1 = arith.constant 0 : i32
    return %c0_i32, %c0_i32_0 : i32, i32
  }
  func.func @transform_11(%arg0: i32) -> (i32, i32) {
    %c0_i32 = arith.constant 0 : i32
    %c0_i32_0 = arith.constant 0 : i32
    %c0_i32_1 = arith.constant 0 : i32
    return %c0_i32, %c0_i32_0 : i32, i32
  }
  func.func @transform_12(%arg0: i32) -> (i32, i32) {
    %c0_i32 = arith.constant 0 : i32
    %c0_i32_0 = arith.constant 0 : i32
    %c0_i32_1 = arith.constant 0 : i32
    return %c0_i32, %c0_i32_0 : i32, i32
  }
  func.func @transform_13(%arg0: i32) -> (i32, i32) {
    %c0_i32 = arith.constant 0 : i32
    %c0_i32_0 = arith.constant 0 : i32
    %c0_i32_1 = arith.constant 0 : i32
    return %c0_i32, %c0_i32_0 : i32, i32
  }
  func.func @transform_14(%arg0: i32) -> (i32, i32, i32) {
    %c0_i32 = arith.constant 0 : i32
    %c0_i32_0 = arith.constant 0 : i32
    %c0_i32_1 = arith.constant 0 : i32
    return %arg0, %c0_i32, %c0_i32_0 : i32, i32, i32
  }
}

module attributes {stable_mosaic.version = 11 : i64} {
  func.func @_block_kernel(%arg0: i32, %arg1: memref<1x16x32xf32, #tpu.memory_space<vmem>>, %arg2: memref<1x16x32xf32, #tpu.memory_space<vmem>>, %arg3: memref<1x32xf32, #tpu.memory_space<vmem>>, %arg4: memref<1x32xf32, #tpu.memory_space<vmem>>, %arg5: memref<32x96xf32, #tpu.memory_space<vmem>>, %arg6: memref<1x96xf32, #tpu.memory_space<vmem>>, %arg7: memref<32x32xf32, #tpu.memory_space<vmem>>, %arg8: memref<1x32xf32, #tpu.memory_space<vmem>>, %arg9: memref<1x32xf32, #tpu.memory_space<vmem>>, %arg10: memref<1x32xf32, #tpu.memory_space<vmem>>, %arg11: memref<32x128xf32, #tpu.memory_space<vmem>>, %arg12: memref<1x128xf32, #tpu.memory_space<vmem>>, %arg13: memref<128x32xf32, #tpu.memory_space<vmem>>, %arg14: memref<1x32xf32, #tpu.memory_space<vmem>>, %arg15: memref<1x16x32xf32, #tpu.memory_space<vmem>>) attributes {dimension_semantics = [#tpu.dimension_semantics<parallel>], iteration_bounds = array<i64: 2>, scalar_prefetch = 0 : i64, scratch_operands = 0 : i64, tpu.core_type = #tpu.core_type<tc>, window_params = [{transform_indices = @transform_0, window_bounds = array<i64: 1, 16, 32>}, {transform_indices = @transform_1, window_bounds = array<i64: 1, 16, 32>}, {pipeline_mode = #tpu.pipeline_mode<synchronous>, transform_indices = @transform_2, window_bounds = array<i64: 1, 32>}, {pipeline_mode = #tpu.pipeline_mode<synchronous>, transform_indices = @transform_3, window_bounds = array<i64: 1, 32>}, {pipeline_mode = #tpu.pipeline_mode<synchronous>, transform_indices = @transform_4, window_bounds = array<i64: 32, 96>}, {pipeline_mode = #tpu.pipeline_mode<synchronous>, transform_indices = @transform_5, window_bounds = array<i64: 1, 96>}, {pipeline_mode = #tpu.pipeline_mode<synchronous>, transform_indices = @transform_6, window_bounds = array<i64: 32, 32>}, {pipeline_mode = #tpu.pipeline_mode<synchronous>, transform_indices = @transform_7, window_bounds = array<i64: 1, 32>}, {pipeline_mode = #tpu.pipeline_mode<synchronous>, transform_indices = @transform_8, window_bounds = array<i64: 1, 32>}, {pipeline_mode = #tpu.pipeline_mode<synchronous>, transform_indices = @transform_9, window_bounds = array<i64: 1, 32>}, {pipeline_mode = #tpu.pipeline_mode<synchronous>, transform_indices = @transform_10, window_bounds = array<i64: 32, 128>}, {pipeline_mode = #tpu.pipeline_mode<synchronous>, transform_indices = @transform_11, window_bounds = array<i64: 1, 128>}, {pipeline_mode = #tpu.pipeline_mode<synchronous>, transform_indices = @transform_12, window_bounds = array<i64: 128, 32>}, {pipeline_mode = #tpu.pipeline_mode<synchronous>, transform_indices = @transform_13, window_bounds = array<i64: 1, 32>}, {transform_indices = @transform_14, window_bounds = array<i64: 1, 16, 32>}]} {
    %c0 = arith.constant 0 : index
    %c0_0 = arith.constant 0 : index
    %c0_1 = arith.constant 0 : index
    %0 = vector.load %arg1[%c0, %c0_0, %c0_1] : memref<1x16x32xf32, #tpu.memory_space<vmem>>, vector<1x16x32xf32>
    %1 = vector.shape_cast %0 : vector<1x16x32xf32> to vector<16x32xf32>
    %c0_2 = arith.constant 0 : index
    %c0_3 = arith.constant 0 : index
    %c0_4 = arith.constant 0 : index
    %2 = vector.load %arg2[%c0_2, %c0_3, %c0_4] : memref<1x16x32xf32, #tpu.memory_space<vmem>>, vector<1x16x32xf32>
    %3 = vector.shape_cast %2 : vector<1x16x32xf32> to vector<16x32xf32>
    %4 = arith.addf %1, %3 : vector<16x32xf32>
    %c0_5 = arith.constant 0 : index
    %c0_6 = arith.constant 0 : index
    %5 = vector.load %arg3[%c0_5, %c0_6] : memref<1x32xf32, #tpu.memory_space<vmem>>, vector<1x32xf32>
    %c0_7 = arith.constant 0 : index
    %c0_8 = arith.constant 0 : index
    %6 = vector.load %arg4[%c0_7, %c0_8] : memref<1x32xf32, #tpu.memory_space<vmem>>, vector<1x32xf32>
    %cst = arith.constant dense<0.000000e+00> : vector<16xf32>
    %7 = vector.multi_reduction <add>, %4, %cst [1] : vector<16x32xf32> to vector<16xf32>
    %8 = vector.shape_cast %7 : vector<16xf32> to vector<16x1xf32>
    %cst_9 = arith.constant 3.200000e+01 : f32
    %9 = vector.broadcast %cst_9 : f32 to vector<16x1xf32>
    %10 = arith.divf %8, %9 : vector<16x1xf32>
    %11 = vector.broadcast %10 : vector<16x1xf32> to vector<16x32xf32>
    %12 = arith.subf %4, %11 : vector<16x32xf32>
    %13 = arith.mulf %12, %12 : vector<16x32xf32>
    %cst_10 = arith.constant dense<0.000000e+00> : vector<16xf32>
    %14 = vector.multi_reduction <add>, %13, %cst_10 [1] : vector<16x32xf32> to vector<16xf32>
    %15 = vector.shape_cast %14 : vector<16xf32> to vector<16x1xf32>
    %cst_11 = arith.constant 3.200000e+01 : f32
    %16 = vector.broadcast %cst_11 : f32 to vector<16x1xf32>
    %17 = arith.divf %15, %16 : vector<16x1xf32>
    %18 = vector.broadcast %10 : vector<16x1xf32> to vector<16x32xf32>
    %19 = arith.subf %4, %18 : vector<16x32xf32>
    %cst_12 = arith.constant 9.99999974E-6 : f32
    %20 = vector.broadcast %cst_12 : f32 to vector<16x1xf32>
    %21 = arith.addf %17, %20 : vector<16x1xf32>
    %22 = math.rsqrt %21 : vector<16x1xf32>
    %23 = vector.broadcast %22 : vector<16x1xf32> to vector<16x32xf32>
    %24 = arith.mulf %19, %23 : vector<16x32xf32>
    %25 = vector.broadcast %5 : vector<1x32xf32> to vector<16x32xf32>
    %26 = arith.mulf %24, %25 : vector<16x32xf32>
    %27 = vector.broadcast %6 : vector<1x32xf32> to vector<16x32xf32>
    %28 = arith.addf %26, %27 : vector<16x32xf32>
    %c0_13 = arith.constant 0 : index
    %c0_14 = arith.constant 0 : index
    %29 = vector.load %arg5[%c0_13, %c0_14] : memref<32x96xf32, #tpu.memory_space<vmem>>, vector<32x96xf32>
    %cst_15 = arith.constant dense<0.000000e+00> : vector<16x96xf32>
    %30 = tpu.matmul %28, %29, %cst_15 {dimension_numbers = #tpu.dot_dimension_numbers<[1], [0], [0], [1], [0, 0, 1, 1], [], []>} : vector<16x32xf32>, vector<32x96xf32>, vector<16x96xf32> -> vector<16x96xf32>
    %c0_16 = arith.constant 0 : index
    %c0_17 = arith.constant 0 : index
    %31 = vector.load %arg6[%c0_16, %c0_17] : memref<1x96xf32, #tpu.memory_space<vmem>>, vector<1x96xf32>
    %32 = vector.broadcast %31 : vector<1x96xf32> to vector<16x96xf32>
    %33 = arith.addf %30, %32 : vector<16x96xf32>
    %34 = vector.extract_strided_slice %33 {offsets = [0, 0], sizes = [16, 32], strides = [1, 1]} : vector<16x96xf32> to vector<16x32xf32>
    %35 = vector.extract_strided_slice %33 {offsets = [0, 32], sizes = [16, 32], strides = [1, 1]} : vector<16x96xf32> to vector<16x32xf32>
    %36 = vector.extract_strided_slice %33 {offsets = [0, 64], sizes = [16, 32], strides = [1, 1]} : vector<16x96xf32> to vector<16x32xf32>
    %37 = vector.extract_strided_slice %34 {offsets = [0, 0], sizes = [16, 8], strides = [1, 1]} : vector<16x32xf32> to vector<16x8xf32>
    %cst_18 = arith.constant 0.353553385 : f32
    %38 = vector.broadcast %cst_18 : f32 to vector<16x8xf32>
    %39 = arith.mulf %37, %38 : vector<16x8xf32>
    %40 = vector.extract_strided_slice %35 {offsets = [0, 0], sizes = [16, 8], strides = [1, 1]} : vector<16x32xf32> to vector<16x8xf32>
    %41 = vector.extract_strided_slice %36 {offsets = [0, 0], sizes = [16, 8], strides = [1, 1]} : vector<16x32xf32> to vector<16x8xf32>
    %cst_19 = arith.constant dense<0.000000e+00> : vector<16x16xf32>
    %42 = tpu.matmul %39, %40, %cst_19 {dimension_numbers = #tpu.dot_dimension_numbers<[1], [1], [0], [0], [0, 0, 1, 0], [], []>} : vector<16x8xf32>, vector<16x8xf32>, vector<16x16xf32> -> vector<16x16xf32>
    %cst_20 = arith.constant dense<0xFF800000> : vector<16xf32>
    %43 = vector.multi_reduction <maximumf>, %42, %cst_20 [1] : vector<16x16xf32> to vector<16xf32>
    %44 = vector.shape_cast %43 : vector<16xf32> to vector<16x1xf32>
    %45 = vector.broadcast %44 : vector<16x1xf32> to vector<16x16xf32>
    %46 = arith.subf %42, %45 : vector<16x16xf32>
    %47 = math.exp %46 : vector<16x16xf32>
    %cst_21 = arith.constant dense<0.000000e+00> : vector<16xf32>
    %48 = vector.multi_reduction <add>, %47, %cst_21 [1] : vector<16x16xf32> to vector<16xf32>
    %49 = vector.shape_cast %48 : vector<16xf32> to vector<16x1xf32>
    %50 = vector.broadcast %49 : vector<16x1xf32> to vector<16x16xf32>
    %51 = arith.divf %47, %50 : vector<16x16xf32>
    %cst_22 = arith.constant dense<0.000000e+00> : vector<16x8xf32>
    %52 = tpu.matmul %51, %41, %cst_22 {dimension_numbers = #tpu.dot_dimension_numbers<[1], [0], [0], [1], [0, 0, 1, 1], [], []>} : vector<16x16xf32>, vector<16x8xf32>, vector<16x8xf32> -> vector<16x8xf32>
    %53 = vector.extract_strided_slice %34 {offsets = [0, 8], sizes = [16, 8], strides = [1, 1]} : vector<16x32xf32> to vector<16x8xf32>
    %cst_23 = arith.constant 0.353553385 : f32
    %54 = vector.broadcast %cst_23 : f32 to vector<16x8xf32>
    %55 = arith.mulf %53, %54 : vector<16x8xf32>
    %56 = vector.extract_strided_slice %35 {offsets = [0, 8], sizes = [16, 8], strides = [1, 1]} : vector<16x32xf32> to vector<16x8xf32>
    %57 = vector.extract_strided_slice %36 {offsets = [0, 8], sizes = [16, 8], strides = [1, 1]} : vector<16x32xf32> to vector<16x8xf32>
    %cst_24 = arith.constant dense<0.000000e+00> : vector<16x16xf32>
    %58 = tpu.matmul %55, %56, %cst_24 {dimension_numbers = #tpu.dot_dimension_numbers<[1], [1], [0], [0], [0, 0, 1, 0], [], []>} : vector<16x8xf32>, vector<16x8xf32>, vector<16x16xf32> -> vector<16x16xf32>
    %cst_25 = arith.constant dense<0xFF800000> : vector<16xf32>
    %59 = vector.multi_reduction <maximumf>, %58, %cst_25 [1] : vector<16x16xf32> to vector<16xf32>
    %60 = vector.shape_cast %59 : vector<16xf32> to vector<16x1xf32>
    %61 = vector.broadcast %60 : vector<16x1xf32> to vector<16x16xf32>
    %62 = arith.subf %58, %61 : vector<16x16xf32>
    %63 = math.exp %62 : vector<16x16xf32>
    %cst_26 = arith.constant dense<0.000000e+00> : vector<16xf32>
    %64 = vector.multi_reduction <add>, %63, %cst_26 [1] : vector<16x16xf32> to vector<16xf32>
    %65 = vector.shape_cast %64 : vector<16xf32> to vector<16x1xf32>
    %66 = vector.broadcast %65 : vector<16x1xf32> to vector<16x16xf32>
    %67 = arith.divf %63, %66 : vector<16x16xf32>
    %cst_27 = arith.constant dense<0.000000e+00> : vector<16x8xf32>
    %68 = tpu.matmul %67, %57, %cst_27 {dimension_numbers = #tpu.dot_dimension_numbers<[1], [0], [0], [1], [0, 0, 1, 1], [], []>} : vector<16x16xf32>, vector<16x8xf32>, vector<16x8xf32> -> vector<16x8xf32>
    %69 = vector.extract_strided_slice %34 {offsets = [0, 16], sizes = [16, 8], strides = [1, 1]} : vector<16x32xf32> to vector<16x8xf32>
    %cst_28 = arith.constant 0.353553385 : f32
    %70 = vector.broadcast %cst_28 : f32 to vector<16x8xf32>
    %71 = arith.mulf %69, %70 : vector<16x8xf32>
    %72 = vector.extract_strided_slice %35 {offsets = [0, 16], sizes = [16, 8], strides = [1, 1]} : vector<16x32xf32> to vector<16x8xf32>
    %73 = vector.extract_strided_slice %36 {offsets = [0, 16], sizes = [16, 8], strides = [1, 1]} : vector<16x32xf32> to vector<16x8xf32>
    %cst_29 = arith.constant dense<0.000000e+00> : vector<16x16xf32>
    %74 = tpu.matmul %71, %72, %cst_29 {dimension_numbers = #tpu.dot_dimension_numbers<[1], [1], [0], [0], [0, 0, 1, 0], [], []>} : vector<16x8xf32>, vector<16x8xf32>, vector<16x16xf32> -> vector<16x16xf32>
    %cst_30 = arith.constant dense<0xFF800000> : vector<16xf32>
    %75 = vector.multi_reduction <maximumf>, %74, %cst_30 [1] : vector<16x16xf32> to vector<16xf32>
    %76 = vector.shape_cast %75 : vector<16xf32> to vector<16x1xf32>
    %77 = vector.broadcast %76 : vector<16x1xf32> to vector<16x16xf32>
    %78 = arith.subf %74, %77 : vector<16x16xf32>
    %79 = math.exp %78 : vector<16x16xf32>
    %cst_31 = arith.constant dense<0.000000e+00> : vector<16xf32>
    %80 = vector.multi_reduction <add>, %79, %cst_31 [1] : vector<16x16xf32> to vector<16xf32>
    %81 = vector.shape_cast %80 : vector<16xf32> to vector<16x1xf32>
    %82 = vector.broadcast %81 : vector<16x1xf32> to vector<16x16xf32>
    %83 = arith.divf %79, %82 : vector<16x16xf32>
    %cst_32 = arith.constant dense<0.000000e+00> : vector<16x8xf32>
    %84 = tpu.matmul %83, %73, %cst_32 {dimension_numbers = #tpu.dot_dimension_numbers<[1], [0], [0], [1], [0, 0, 1, 1], [], []>} : vector<16x16xf32>, vector<16x8xf32>, vector<16x8xf32> -> vector<16x8xf32>
    %85 = vector.extract_strided_slice %34 {offsets = [0, 24], sizes = [16, 8], strides = [1, 1]} : vector<16x32xf32> to vector<16x8xf32>
    %cst_33 = arith.constant 0.353553385 : f32
    %86 = vector.broadcast %cst_33 : f32 to vector<16x8xf32>
    %87 = arith.mulf %85, %86 : vector<16x8xf32>
    %88 = vector.extract_strided_slice %35 {offsets = [0, 24], sizes = [16, 8], strides = [1, 1]} : vector<16x32xf32> to vector<16x8xf32>
    %89 = vector.extract_strided_slice %36 {offsets = [0, 24], sizes = [16, 8], strides = [1, 1]} : vector<16x32xf32> to vector<16x8xf32>
    %cst_34 = arith.constant dense<0.000000e+00> : vector<16x16xf32>
    %90 = tpu.matmul %87, %88, %cst_34 {dimension_numbers = #tpu.dot_dimension_numbers<[1], [1], [0], [0], [0, 0, 1, 0], [], []>} : vector<16x8xf32>, vector<16x8xf32>, vector<16x16xf32> -> vector<16x16xf32>
    %cst_35 = arith.constant dense<0xFF800000> : vector<16xf32>
    %91 = vector.multi_reduction <maximumf>, %90, %cst_35 [1] : vector<16x16xf32> to vector<16xf32>
    %92 = vector.shape_cast %91 : vector<16xf32> to vector<16x1xf32>
    %93 = vector.broadcast %92 : vector<16x1xf32> to vector<16x16xf32>
    %94 = arith.subf %90, %93 : vector<16x16xf32>
    %95 = math.exp %94 : vector<16x16xf32>
    %cst_36 = arith.constant dense<0.000000e+00> : vector<16xf32>
    %96 = vector.multi_reduction <add>, %95, %cst_36 [1] : vector<16x16xf32> to vector<16xf32>
    %97 = vector.shape_cast %96 : vector<16xf32> to vector<16x1xf32>
    %98 = vector.broadcast %97 : vector<16x1xf32> to vector<16x16xf32>
    %99 = arith.divf %95, %98 : vector<16x16xf32>
    %cst_37 = arith.constant dense<0.000000e+00> : vector<16x8xf32>
    %100 = tpu.matmul %99, %89, %cst_37 {dimension_numbers = #tpu.dot_dimension_numbers<[1], [0], [0], [1], [0, 0, 1, 1], [], []>} : vector<16x16xf32>, vector<16x8xf32>, vector<16x8xf32> -> vector<16x8xf32>
    %101 = tpu.concatenate %52, %68, %84, %100 in 1 : vector<16x8xf32>, vector<16x8xf32>, vector<16x8xf32>, vector<16x8xf32> -> vector<16x32xf32>
    %c0_38 = arith.constant 0 : index
    %c0_39 = arith.constant 0 : index
    %102 = vector.load %arg7[%c0_38, %c0_39] : memref<32x32xf32, #tpu.memory_space<vmem>>, vector<32x32xf32>
    %cst_40 = arith.constant dense<0.000000e+00> : vector<16x32xf32>
    %103 = tpu.matmul %101, %102, %cst_40 {dimension_numbers = #tpu.dot_dimension_numbers<[1], [0], [0], [1], [0, 0, 1, 1], [], []>} : vector<16x32xf32>, vector<32x32xf32>, vector<16x32xf32> -> vector<16x32xf32>
    %c0_41 = arith.constant 0 : index
    %c0_42 = arith.constant 0 : index
    %104 = vector.load %arg8[%c0_41, %c0_42] : memref<1x32xf32, #tpu.memory_space<vmem>>, vector<1x32xf32>
    %105 = vector.broadcast %104 : vector<1x32xf32> to vector<16x32xf32>
    %106 = arith.addf %103, %105 : vector<16x32xf32>
    %107 = arith.addf %4, %106 : vector<16x32xf32>
    %c0_43 = arith.constant 0 : index
    %c0_44 = arith.constant 0 : index
    %108 = vector.load %arg9[%c0_43, %c0_44] : memref<1x32xf32, #tpu.memory_space<vmem>>, vector<1x32xf32>
    %c0_45 = arith.constant 0 : index
    %c0_46 = arith.constant 0 : index
    %109 = vector.load %arg10[%c0_45, %c0_46] : memref<1x32xf32, #tpu.memory_space<vmem>>, vector<1x32xf32>
    %cst_47 = arith.constant dense<0.000000e+00> : vector<16xf32>
    %110 = vector.multi_reduction <add>, %107, %cst_47 [1] : vector<16x32xf32> to vector<16xf32>
    %111 = vector.shape_cast %110 : vector<16xf32> to vector<16x1xf32>
    %cst_48 = arith.constant 3.200000e+01 : f32
    %112 = vector.broadcast %cst_48 : f32 to vector<16x1xf32>
    %113 = arith.divf %111, %112 : vector<16x1xf32>
    %114 = vector.broadcast %113 : vector<16x1xf32> to vector<16x32xf32>
    %115 = arith.subf %107, %114 : vector<16x32xf32>
    %116 = arith.mulf %115, %115 : vector<16x32xf32>
    %cst_49 = arith.constant dense<0.000000e+00> : vector<16xf32>
    %117 = vector.multi_reduction <add>, %116, %cst_49 [1] : vector<16x32xf32> to vector<16xf32>
    %118 = vector.shape_cast %117 : vector<16xf32> to vector<16x1xf32>
    %cst_50 = arith.constant 3.200000e+01 : f32
    %119 = vector.broadcast %cst_50 : f32 to vector<16x1xf32>
    %120 = arith.divf %118, %119 : vector<16x1xf32>
    %121 = vector.broadcast %113 : vector<16x1xf32> to vector<16x32xf32>
    %122 = arith.subf %107, %121 : vector<16x32xf32>
    %cst_51 = arith.constant 9.99999974E-6 : f32
    %123 = vector.broadcast %cst_51 : f32 to vector<16x1xf32>
    %124 = arith.addf %120, %123 : vector<16x1xf32>
    %125 = math.rsqrt %124 : vector<16x1xf32>
    %126 = vector.broadcast %125 : vector<16x1xf32> to vector<16x32xf32>
    %127 = arith.mulf %122, %126 : vector<16x32xf32>
    %128 = vector.broadcast %108 : vector<1x32xf32> to vector<16x32xf32>
    %129 = arith.mulf %127, %128 : vector<16x32xf32>
    %130 = vector.broadcast %109 : vector<1x32xf32> to vector<16x32xf32>
    %131 = arith.addf %129, %130 : vector<16x32xf32>
    %c0_52 = arith.constant 0 : index
    %c0_53 = arith.constant 0 : index
    %132 = vector.load %arg11[%c0_52, %c0_53] : memref<32x128xf32, #tpu.memory_space<vmem>>, vector<32x128xf32>
    %cst_54 = arith.constant dense<0.000000e+00> : vector<16x128xf32>
    %133 = tpu.matmul %131, %132, %cst_54 {dimension_numbers = #tpu.dot_dimension_numbers<[1], [0], [0], [1], [0, 0, 1, 1], [], []>} : vector<16x32xf32>, vector<32x128xf32>, vector<16x128xf32> -> vector<16x128xf32>
    %c0_55 = arith.constant 0 : index
    %c0_56 = arith.constant 0 : index
    %134 = vector.load %arg12[%c0_55, %c0_56] : memref<1x128xf32, #tpu.memory_space<vmem>>, vector<1x128xf32>
    %135 = vector.broadcast %134 : vector<1x128xf32> to vector<16x128xf32>
    %136 = arith.addf %133, %135 : vector<16x128xf32>
    %cst_57 = arith.constant 5.000000e-01 : f32
    %137 = vector.broadcast %cst_57 : f32 to vector<16x128xf32>
    %138 = arith.mulf %137, %136 : vector<16x128xf32>
    %cst_58 = arith.constant 4.471500e-02 : f32
    %139 = vector.broadcast %cst_58 : f32 to vector<16x128xf32>
    %140 = arith.mulf %139, %136 : vector<16x128xf32>
    %141 = arith.mulf %140, %136 : vector<16x128xf32>
    %142 = arith.mulf %141, %136 : vector<16x128xf32>
    %143 = arith.addf %136, %142 : vector<16x128xf32>
    %cst_59 = arith.constant 0.797884583 : f32
    %144 = vector.broadcast %cst_59 : f32 to vector<16x128xf32>
    %145 = arith.mulf %144, %143 : vector<16x128xf32>
    %146 = math.tanh %145 : vector<16x128xf32>
    %cst_60 = arith.constant 1.000000e+00 : f32
    %147 = vector.broadcast %cst_60 : f32 to vector<16x128xf32>
    %148 = arith.addf %147, %146 : vector<16x128xf32>
    %149 = arith.mulf %138, %148 : vector<16x128xf32>
    %c0_61 = arith.constant 0 : index
    %c0_62 = arith.constant 0 : index
    %150 = vector.load %arg13[%c0_61, %c0_62] : memref<128x32xf32, #tpu.memory_space<vmem>>, vector<128x32xf32>
    %cst_63 = arith.constant dense<0.000000e+00> : vector<16x32xf32>
    %151 = tpu.matmul %149, %150, %cst_63 {dimension_numbers = #tpu.dot_dimension_numbers<[1], [0], [0], [1], [0, 0, 1, 1], [], []>} : vector<16x128xf32>, vector<128x32xf32>, vector<16x32xf32> -> vector<16x32xf32>
    %c0_64 = arith.constant 0 : index
    %c0_65 = arith.constant 0 : index
    %152 = vector.load %arg14[%c0_64, %c0_65] : memref<1x32xf32, #tpu.memory_space<vmem>>, vector<1x32xf32>
    %153 = vector.broadcast %152 : vector<1x32xf32> to vector<16x32xf32>
    %154 = arith.addf %151, %153 : vector<16x32xf32>
    %155 = arith.addf %107, %154 : vector<16x32xf32>
    %c0_66 = arith.constant 0 : index
    %c0_67 = arith.constant 0 : index
    %c0_68 = arith.constant 0 : index
    %156 = vector.load %arg15[%c0_66, %c0_67, %c0_68] : memref<1x16x32xf32, #tpu.memory_space<vmem>>, vector<1x16x32xf32>
    %157 = vector.shape_cast %156 : vector<1x16x32xf32> to vector<16x32xf32>
    %158 = vector.shape_cast %155 : vector<16x32xf32> to vector<1x16x32xf32>
    tpu.vector_store %arg15[%c0_66, %c0_67, %c0_68], %158 {strides = array<i32>} : memref<1x16x32xf32, #tpu.memory_space<vmem>>, vector<1x16x32xf32>,
    return
  }
  func.func @transform_0(%arg0: i32) -> (i32, i32, i32) {
    %c0_i32 = arith.constant 0 : i32
    %c0_i32_0 = arith.constant 0 : i32
    %c0_i32_1 = arith.constant 0 : i32
    return %arg0, %c0_i32, %c0_i32_0 : i32, i32, i32
  }
  func.func @transform_1(%arg0: i32) -> (i32, i32, i32) {
    %c0_i32 = arith.constant 0 : i32
    %c0_i32_0 = arith.constant 0 : i32
    %c0_i32_1 = arith.constant 0 : i32
    return %arg0, %c0_i32, %c0_i32_0 : i32, i32, i32
  }
  func.func @transform_2(%arg0: i32) -> (i32, i32) {
    %c0_i32 = arith.constant 0 : i32
    %c0_i32_0 = arith.constant 0 : i32
    %c0_i32_1 = arith.constant 0 : i32
    return %c0_i32, %c0_i32_0 : i32, i32
  }
  func.func @transform_3(%arg0: i32) -> (i32, i32) {
    %c0_i32 = arith.constant 0 : i32
    %c0_i32_0 = arith.constant 0 : i32
    %c0_i32_1 = arith.constant 0 : i32
    return %c0_i32, %c0_i32_0 : i32, i32
  }
  func.func @transform_4(%arg0: i32) -> (i32, i32) {
    %c0_i32 = arith.constant 0 : i32
    %c0_i32_0 = arith.constant 0 : i32
    %c0_i32_1 = arith.constant 0 : i32
    return %c0_i32, %c0_i32_0 : i32, i32
  }
  func.func @transform_5(%arg0: i32) -> (i32, i32) {
    %c0_i32 = arith.constant 0 : i32
    %c0_i32_0 = arith.constant 0 : i32
    %c0_i32_1 = arith.constant 0 : i32
    return %c0_i32, %c0_i32_0 : i32, i32
  }
  func.func @transform_6(%arg0: i32) -> (i32, i32) {
    %c0_i32 = arith.constant 0 : i32
    %c0_i32_0 = arith.constant 0 : i32
    %c0_i32_1 = arith.constant 0 : i32
    return %c0_i32, %c0_i32_0 : i32, i32
  }
  func.func @transform_7(%arg0: i32) -> (i32, i32) {
    %c0_i32 = arith.constant 0 : i32
    %c0_i32_0 = arith.constant 0 : i32
    %c0_i32_1 = arith.constant 0 : i32
    return %c0_i32, %c0_i32_0 : i32, i32
  }
  func.func @transform_8(%arg0: i32) -> (i32, i32) {
    %c0_i32 = arith.constant 0 : i32
    %c0_i32_0 = arith.constant 0 : i32
    %c0_i32_1 = arith.constant 0 : i32
    return %c0_i32, %c0_i32_0 : i32, i32
  }
  func.func @transform_9(%arg0: i32) -> (i32, i32) {
    %c0_i32 = arith.constant 0 : i32
    %c0_i32_0 = arith.constant 0 : i32
    %c0_i32_1 = arith.constant 0 : i32
    return %c0_i32, %c0_i32_0 : i32, i32
  }
  func.func @transform_10(%arg0: i32) -> (i32, i32) {
    %c0_i32 = arith.constant 0 : i32
    %c0_i32_0 = arith.constant 0 : i32
    %c0_i32_1 = arith.constant 0 : i32
    return %c0_i32, %c0_i32_0 : i32, i32
  }
  func.func @transform_11(%arg0: i32) -> (i32, i32) {
    %c0_i32 = arith.constant 0 : i32
    %c0_i32_0 = arith.constant 0 : i32
    %c0_i32_1 = arith.constant 0 : i32
    return %c0_i32, %c0_i32_0 : i32, i32
  }
  func.func @transform_12(%arg0: i32) -> (i32, i32) {
    %c0_i32 = arith.constant 0 : i32
    %c0_i32_0 = arith.constant 0 : i32
    %c0_i32_1 = arith.constant 0 : i32
    return %c0_i32, %c0_i32_0 : i32, i32
  }
  func.func @transform_13(%arg0: i32) -> (i32, i32) {
    %c0_i32 = arith.constant 0 : i32
    %c0_i32_0 = arith.constant 0 : i32
    %c0_i32_1 = arith.constant 0 : i32
    return %c0_i32, %c0_i32_0 : i32, i32
  }
  func.func @transform_14(%arg0: i32) -> (i32, i32, i32) {
    %c0_i32 = arith.constant 0 : i32
    %c0_i32_0 = arith.constant 0 : i32
    %c0_i32_1 = arith.constant 0 : i32
    return %arg0, %c0_i32, %c0_i32_0 : i32, i32, i32
  }
}

</mosaic_0001>

<bundles_post_ra>
// kernel: _encoder_forward.3
= control target key start
LH: loop header
LB: loop body
LE: loop exit
PB: predicated region body
PF: predicated region fallthrough
CT: control target
= control target key end

     0   :  { %s2755_s0 = inlined_call_operand.vmem [shape: f32[2,16,32], index: 0, kind: input, shape index: {}]   ;;  %s2756_s1 = inlined_call_operand.vmem [shape: f32[2,16,32], index: 1, kind: input, shape index: {}]   ;;  %s2757_s2 = inlined_call_operand.vmem [shape: f32[1,32], index: 2, kind: input, shape index: {}]   ;;  %s2758_s3 = inlined_call_operand.vmem [shape: f32[1,32], index: 3, kind: input, shape index: {}]   ;;  %s2759_s4 = inlined_call_operand.vmem [shape: f32[32,96], index: 4, kind: input, shape index: {}]   ;;  %s2760_s5 = inlined_call_operand.vmem [shape: f32[1,96], index: 5, kind: input, shape index: {}]   ;;  %s2761_s6 = inlined_call_operand.vmem [shape: f32[32,32], index: 6, kind: input, shape index: {}]   ;;  %s2762_s7 = inlined_call_operand.vmem [shape: f32[1,32], index: 7, kind: input, shape index: {}]   ;;  %s2763_s8 = inlined_call_operand.vmem [shape: f32[1,32], index: 8, kind: input, shape index: {}]   ;;  %s2764_s9 = inlined_call_operand.vmem [shape: f32[1,32], index: 9, kind: input, shape index: {}]   ;;  %s2765_s10 = inlined_call_operand.vmem [shape: f32[32,128], index: 10, kind: input, shape index: {}]   ;;  %s2766_s11 = inlined_call_operand.vmem [shape: f32[1,128], index: 11, kind: input, shape index: {}]   ;;  %s2767_s12 = inlined_call_operand.vmem [shape: f32[128,32], index: 12, kind: input, shape index: {}]   ;;  %s2768_s13 = inlined_call_operand.vmem [shape: f32[1,32], index: 13, kind: input, shape index: {}]   ;;  %s2769_s14 = inlined_call_operand.hbm [shape: f32[2,16,32], index: 14, kind: output, shape index: {}]  }
   0x1   :  { %2771 = sst [smem:[#allocation6_spill]] %s2755_s0 }
   0x2   :  { %2772 = sst [smem:[#allocation7_spill]] %s2756_s1 }
   0x3   :  { %2773 = sst [smem:[#allocation8_spill]] %s2757_s2 }
   0x4   :  { %19 = vsyncpa [#allocation3], 0 }
   0x5   :  { %21 = vsyncpa [#allocation3 + $0x1], 0  ;;  %s2401_s29 = smov 0   ;;  %s2403_s30 = smov 0  }
   0x6   :  { %s2405_s15 = smov 0   ;;  %s2407_s16 = smov 0  }
   0x7 LB: > { %s2422_s17 = sadd.s32 4294967295, %s2308_s16   ;;  %s1903_s18 = sadd.s32 4294967294, %s2308_s16   ;;  %s2308_s16 = sphi %s2407_s16, %s2785_s16   ;;  %s2304_s15 = sphi %s2405_s15, %s2784_s15   ;;  %s2300_s30 = sphi %s2403_s30, %s2783_s30   ;;  %s2296_s29 = sphi %s2401_s29, %s2782_s29  }
   0x8   : > { %s2426_s19 = sadd.s32 1, %s2308_s16   ;;  %s338_s20 = sadd.s32 1, %s2304_s15 }
   0x9   : > { %s335_s21 = ssub.s32 %s2308_s16, %s2426_s19  ;;  %p348_p0 = scmp.ne.s32.totalorder %s2304_s15, %s2300_s30 }
   0xa   : > { %p336_p1 = scmp.eq.s32.totalorder %s335_s21, 0  ;;  %p349_p2 = scmp.eq.s32.totalorder %s2422_s17, 1 }
   0xb   : > { %p354_p3 = scmp.ne.s32.totalorder %s2300_s30, %s2296_s29  ;;  %p355_p4 = scmp.eq.s32.totalorder %s1903_s18, 1 }
   0xc   : > { %s2437_s22 = scalar_select %p336_p1, %s2304_s15, %s338_s20  }
   0xd   : > { %p2439_p5 = por %p349_p2, %p348_p0  ;;  %p2443_p6 = por %p355_p4, %p354_p3 }
   0xe   : > { %2774 = sst [smem:[#allocation5_spill]] %s2437_s22  ;;  %p1906_p7 = scmp.ge.s32.totalorder %s2308_s16, 1 }
   0xf   : > { %p425_p8 = scmp.lt.s32.totalorder %s2308_s16, 3 }
  0x11   : > { %p426_p9 = pnand %p1906_p7, %p425_p8 }
  0x12   : > { %p476_p10 = scmp.lt.s32.totalorder (!%p426_p9), %s2422_s17, 1  ;;  %s2777_s0 = sld [smem:[#allocation6_spill]] (!%p426_p9) }
  0x13   : > { %429 = sbr.rel (%p426_p9) target bundleno = 2966 (0xb96), region = 76  ;;  %s2778_s1 = sld [smem:[#allocation7_spill]] (!%p426_p9) }
  0x14   : > { %s2779_s2 = sld [smem:[#allocation8_spill]] (!%p426_p9)  ;;  %s2310_s20 = smov (!%p426_p9), 96  }
  0x15   : > { %s2311_s21 = smov (!%p426_p9), 120   ;;  %s2315_s27 = smov (!%p426_p9), 48  }
  0x16   : > { %s2316_s28 = smov (!%p426_p9), 72  }
  0x18   : > { %s477_s25 = scalar_select %p476_p10, %s2422_s17, 1  ;;  %vm494_vm0 = vcmask 261120   ;;  %v541_v18 = vld [vmem:[%s2759_s4 + $0x18] sm:$0xff]  ;;  %v540_v19 = vld [vmem:[%s2759_s4 + $0x10] sm:$0xff]  ;;  %v539_v20 = vld [vmem:[%s2759_s4 + $0x8] sm:$0xff]  ;;  %vm638_vm1 = vcmask 64512  }
  0x19   : > { %2026 = vmatprep.subr.mxu1 %v541_v18  ;;  %v538_v21 = vld [vmem:[%s2759_s4] sm:$0xff]  ;;  %vm724_vm2 = vcmask 130048   ;;  %vm1462_vm3 = vcmask 195584  }
  0x1a   : > { %s1955_s26 = sshll.u32 %s477_s25, 4  ;;  %2027 = vmatpush3.msra.mxu1 %v541_v18  ;;  %v1912_v29 = vld [vmem:[%s2779_s2] ss:$0 sm:$0xff]  ;;  %s2313_s25 = smov 112  }
  0x1b   : > { %s480_s18 = scalar_lea.vmem %s2777_s0, %s1955_s26  ;;  %s485_s22 = scalar_lea.vmem %s2778_s1, %s1955_s26  ;;  %2028 = vmatprep.subr.mxu1 %v540_v19  ;;  %v1913_v31 = vld [vmem:[%s2758_s3] ss:$0 sm:$0xff] }
  0x1c   : > { %v486_v0 = vld [vmem:[%s480_s18] sm:$0xff]  ;;  %v487_v2 = vld [vmem:[%s480_s18 + $0x8] sm:$0xff]  ;;  %2029 = vmatpush3.msra.mxu1 %v540_v19  ;;  %s2314_s26 = smov 80   ;;  %s2317_s18 = smov 104  }
  0x1d   : > { %v488_v1 = vld [vmem:[%s485_s22] sm:$0xff]  ;;  %v489_v4 = vld [vmem:[%s485_s22 + $0x8] sm:$0xff]  ;;  %2030 = vmatprep.subr.mxu1 %v539_v20  ;;  %s2312_s22 = smov 88   ;;  %s2324_s0 = smov [#allocation2]  }
  0x1e   : > { %v2457_v3 = vadd.f32 %v488_v1, %v486_v0  ;;  %v2459_v5 = vadd.f32 %v489_v4, %v487_v2  ;;  %2031 = vmatpush3.msra.mxu1 %v539_v20  ;;  %v1914_v38 = vld [vmem:[%s2760_s5] ss:$0 sm:$0xff]  ;;  %s2252_s1 = sshll.u32 %s2324_s0, 4  ;;  %s2253_s1 = int_to_ptr.vmem [resolvable:$false] %s2252_s1 }
  0x1f   : > { %2032 = vmatprep.subr.mxu1 %v538_v21  ;;  %s2254_s2 = scalar_lea.vmem %s2253_s1, 512 }
  0x20   : > { %v495_v6 = vsel %vm494_vm0, %v2457_v3, 0.0  ;;  %v498_v7 = vsel %vm494_vm0, %v2459_v5, 0.0  ;;  %2033 = vmatpush3.msra.mxu1 %v538_v21 }
  0x21   : > { %496 = vadd.xlane.f32.xlu0 %v495_v6 }
  0x25   : > { %499 = vadd.xlane.f32.xlu0 %v498_v7 }
  0xaa   : > { %v497_v8 = vpop.xlane.xlu0 %496 }
  0xab   : > { %v502_v9 = vmul.f32 0.03125, %v497_v8 }
  0xad   : > { %v504_v10 = vsub.f32 %v2457_v3, %v502_v9 }
  0xae   : > { %v500_v11 = vpop.xlane.xlu0 %499 }
  0xaf   : > { %v503_v12 = vmul.f32 0.03125, %v500_v11  ;;  %v506_v13 = vmul.f32 %v504_v10, %v504_v10 }
  0xb1   : > { %v505_v14 = vsub.f32 %v2459_v5, %v503_v12  ;;  %v508_v15 = vsel %vm494_vm0, %v506_v13, 0.0 }
  0xb2   : > { %509 = vadd.xlane.f32.xlu1 %v508_v15 }
  0xb3   : > { %v507_v16 = vmul.f32 %v505_v14, %v505_v14 }
  0xb5   : > { %v511_v17 = vsel %vm494_vm0, %v507_v16, 0.0 }
  0xb6   : > { %512 = vadd.xlane.f32.xlu1 %v511_v17 }
 0x13b   : > { %v510_v22 = vpop.xlane.xlu1 %509 }
 0x13c   : > { %v514_v23 = vmul.f32 0.03125, %v510_v22 }
 0x13e   : > { %v516_v24 = vadd.f32 1e-05, %v514_v23 }
 0x13f   : > { %v513_v25 = vpop.xlane.xlu1 %512 }
 0x140   : > { %2204 = vrsqrt.f32 %v516_v24  ;;  %v515_v26 = vmul.f32 0.03125, %v513_v25 }
 0x142   : > { %v517_v27 = vadd.f32 1e-05, %v515_v26 }
 0x144   : > { %2206 = vrsqrt.f32 %v517_v27 }
 0x14d   : > { %v2205_v28 = vpop.eup %2204 }
 0x14e   : > { %v520_v30 = vmul.f32 %v2205_v28, %v504_v10 }
 0x150   : > { %v528_v32 = vmul.f32 %v1912_v29, %v520_v30 }
 0x151   : > { %v2207_v33 = vpop.eup %2206 }
 0x152   : > { %v521_v34 = vmul.f32 %v2207_v33, %v505_v14  ;;  %v536_v35 = vadd.f32 %v1913_v31, %v528_v32 }
 0x154   : > { %v529_v36 = vmul.f32 %v1912_v29, %v521_v34  ;;  %2034 = vmatprep.mubr.msk.f32.mxu1 %vm494_vm0, %v536_v35 }
 0x156   : > { %v537_v37 = vadd.f32 %v1913_v31, %v529_v36 }
 0x158   : > { %2035 = vmatmul.mubr.msk.f32.vlgmr.msra.gmra.mxu1 %vm494_vm0, %v537_v37 }
 0x218   : > { %v2036_v39 = vpop.f32.mrf.mxu1 }
 0x219   : > { %v2492_v40 = vadd.f32 %v2036_v39, %v1914_v38 }
 0x21a   : > { %v621_v41 = vpop.f32.mrf.mxu1 }
 0x21b   : > { %v2494_v42 = vadd.f32 %v1914_v38, %v621_v41  ;;  %636 = vrot.lane.b32.xlu0 %v2492_v40, %s2310_s20  ;;  %v631_v44 = vmul.f32 0.35355338, %v2492_v40 }
 0x21d   : > { %634 = vrot.lane.b32.xlu1 %v2494_v42, %s2310_s20  ;;  %v2499_v43 = vmul.f32 0.35355338, %v2494_v42  ;;  %s2318_s20 = smov 64  }
 0x21f   : > { %834 = vrot.lane.b32.xlu0 %v2499_v43, %s2311_s21  ;;  %2041 = vmatprep.mubr.msk.f32.mxu1 %vm638_vm1, %v2499_v43 }
 0x221   : > { %840 = vrot.lane.b32.xlu1 %v2492_v40, %s2312_s22 }
 0x223   : > { %836 = vrot.lane.b32.xlu0 %v631_v44, %s2311_s21  ;;  %s2319_s21 = smov 56  }
 0x225   : > { %838 = vrot.lane.b32.xlu1 %v2494_v42, %s2312_s22  ;;  %s2320_s22 = smov 40  }
 0x227   : > { %1034 = vrot.lane.b32.xlu0 %v2499_v43, %s2313_s25 }
 0x229   : > { %1040 = vrot.lane.b32.xlu1 %v2492_v40, %s2314_s26 }
 0x22d   : > { %1038 = vrot.lane.b32.xlu1 %v2494_v42, %s2314_s26  ;;  %s2322_s26 = smov 16  }
 0x231   : > { %1036 = vrot.lane.b32.xlu1 %v631_v44, %s2313_s25  ;;  %s2770_s25 = smov 8  }
 0x28d   : > { %v637_v45 = vpop.permute.xlu0 %636 }
 0x28e   : > { %2037 = vmatprep.subr.msk.mxu1 %vm638_vm1, %v637_v45 }
 0x28f   : > { %2038 = vmatpush3.xpose.msk.msra.mxu1 %vm638_vm1, %v637_v45  ;;  %v635_v46 = vpop.permute.xlu1 %634 }
 0x290   : > { %2039 = vmatprep.subr.msk.mxu1 %vm638_vm1, %v635_v46 }
 0x291   : > { %v835_v47 = vpop.permute.xlu0 %834 }
 0x293   : > { %2040 = vmatpush3.xpose.msk.msra.mxu1 %vm638_vm1, %v635_v46  ;;  %v841_v48 = vpop.permute.xlu1 %840 }
 0x294   : > { %2051 = vmatprep.subr.msk.mxu1 %vm638_vm1, %v841_v48 }
 0x295   : > { %v837_v50 = vpop.permute.xlu0 %836 }
 0x296   : > { %2042 = vmatmul.mubr.msk.f32.vlgmr.msra.gmra.mxu1 %vm638_vm1, %v631_v44 }
 0x297   : > { %v839_v49 = vpop.permute.xlu1 %838  ;;  %2052 = vmatpush3.xpose.msk.msra.mxu1 %vm638_vm1, %v841_v48  ;;  %2055 = vmatprep.mubr.msk.f32.mxu1 %vm638_vm1, %v835_v47 }
 0x298   : > { %2053 = vmatprep.subr.msk.mxu1 %vm638_vm1, %v839_v49 }
 0x299   : > { %v1035_v52 = vpop.permute.xlu0 %1034 }
 0x29b   : > { %v1041_v51 = vpop.permute.xlu1 %1040  ;;  %2054 = vmatpush3.xpose.msk.msra.mxu1 %vm638_vm1, %v839_v49 }
 0x29c   : > { %2065 = vmatprep.subr.msk.mxu1 %vm638_vm1, %v1041_v51 }
 0x29e   : > { %2056 = vmatmul.mubr.msk.f32.vlgmr.msra.gmra.mxu1 %vm638_vm1, %v837_v50 }
 0x29f   : > { %v1039_v53 = vpop.permute.xlu1 %1038  ;;  %2066 = vmatpush3.xpose.msk.msra.mxu1 %vm638_vm1, %v1041_v51  ;;  %2069 = vmatprep.mubr.msk.f32.mxu1 %vm638_vm1, %v1035_v52 }
 0x2a0   : > { %2067 = vmatprep.subr.msk.mxu1 %vm638_vm1, %v1039_v53 }
 0x2a3   : > { %2068 = vmatpush3.xpose.msk.msra.mxu1 %vm638_vm1, %v1039_v53  ;;  %v1037_v54 = vpop.permute.xlu1 %1036 }
 0x2a6   : > { %2070 = vmatmul.mubr.msk.f32.vlgmr.msra.gmra.mxu1 %vm638_vm1, %v1037_v54 }
 0x356   : > { %v2527_v55 = vpop.f32.mrf.mxu1 }
 0x357   : > { %v728_v63 = vsel %vm724_vm2, %v2527_v55, -inf }
 0x358   : > { %v2529_v56 = vpop.f32.mrf.mxu1 }
 0x359   : > { %v725_v12 = vsel %vm724_vm2, %v2529_v56, -inf }
 0x35e   : > { %v2531_v57 = vpop.f32.mrf.mxu1 }
 0x35f   : > { %v928_v14 = vsel %vm724_vm2, %v2531_v57, -inf }
 0x360   : > { %v2533_v58 = vpop.f32.mrf.mxu1 }
 0x361   : > { %v925_v13 = vsel %vm724_vm2, %v2533_v58, -inf }
 0x366   : > { %v2071_v59 = vpop.f32.mrf.mxu1 }
 0x367   : > { %v1128_v60 = vsel %vm724_vm2, %v2071_v59, -inf }
 0x368   : > { %1129 = vmax.xlane.f32.xlu1 %v1128_v60  ;;  %v1116_v61 = vpop.f32.mrf.mxu1 }
 0x369   : > { %v1125_v62 = vsel %vm724_vm2, %v1116_v61, -inf }
 0x36a   : > { %1126 = vmax.xlane.f32.xlu0 %v1125_v62 }
 0x379   : > { %1147 = vrot.lane.b32.xlu1 %v2494_v42, %s2315_s27 }
 0x37d   : > { %1240 = vrot.lane.b32.xlu1 %v2492_v40, %s2316_s28 }
 0x381   : > { %1238 = vrot.lane.b32.xlu1 %v2494_v42, %s2316_s28 }
 0x385   : > { %1236 = vrot.lane.b32.xlu1 %v631_v44, %s2317_s18 }
 0x3a9   : > { %729 = vmax.xlane.f32.xlu1 %v728_v63 }
 0x3f1   : > { %v1130_v0 = vpop.xlane.xlu1 %1129 }
 0x3f2   : > { %v1132_v1 = vsub.f32 %v2071_v59, %v1130_v0 }
 0x3f3   : > { %v1127_v2 = vpop.xlane.xlu0 %1126 }
 0x3f4   : > { %v1135_v4 = vmul.f32 1.442695, %v1132_v1  ;;  %v1131_v6 = vsub.f32 %v1116_v61, %v1127_v2 }
 0x3f5   : > { %v1148_v17 = vpop.permute.xlu1 %1147 }
 0x3f6   : > { %2208 = vpow2.f32 %v1135_v4  ;;  %v1133_v7 = vmul.f32 1.442695, %v1131_v6 }
 0x3f8   : > { %2210 = vpow2.f32 %v1133_v7 }
 0x3f9   : > { %v1241_v19 = vpop.permute.xlu1 %1240 }
 0x3fd   : > { %v1239_v25 = vpop.permute.xlu1 %1238 }
 0x401   : > { %v1237_v26 = vpop.permute.xlu1 %1236 }
 0x403   : > { %v2209_v8 = vpop.eup %2208 }
 0x404   : > { %v1140_v9 = vsel %vm724_vm2, %v2209_v8, 0.0 }
 0x405   : > { %v2211_v10 = vpop.eup %2210  ;;  %1141 = vadd.xlane.f32.xlu0 %v1140_v9 }
 0x406   : > { %v1137_v11 = vsel %vm724_vm2, %v2211_v10, 0.0 }
 0x409   : > { %1138 = vadd.xlane.f32.xlu0 %v1137_v11 }
 0x41f   : > { %1149 = vrot.lane.b32.xlu0 %v2492_v40, %s2315_s27  ;;  %s2323_s27 = smov 24  }
 0x423   : > { %1234 = vrot.lane.b32.xlu0 %v2499_v43, %s2317_s18 }
 0x432   : > { %v730_v29 = vpop.xlane.xlu1 %729 }
 0x433   : > { %v732_v30 = vsub.f32 %v2527_v55, %v730_v29  ;;  %v1468_v29 = vld [vmem:[%s2761_s6 + $0x18] sm:$0xff] }
 0x435   : > { %v735_v33 = vmul.f32 1.442695, %v732_v30  ;;  %v1467_v30 = vld [vmem:[%s2761_s6 + $0x10] sm:$0xff] }
 0x442   : > { %726 = vmax.xlane.f32.xlu0 %v725_v12 }
 0x446   : > { %926 = vmax.xlane.f32.xlu0 %v925_v13 }
 0x44a   : > { %929 = vmax.xlane.f32.xlu0 %v928_v14 }
 0x48e   : > { %v1142_v15 = vpop.xlane.xlu0 %1141 }
 0x48f   : > { %2212 = vrcp.f32 %v1142_v15 }
 0x492   : > { %v1139_v16 = vpop.xlane.xlu0 %1138 }
 0x493   : > { %2214 = vrcp.f32 %v1139_v16 }
 0x494   : > { %2216 = vpow2.f32 %v735_v33 }
 0x496   : > { %v1150_v18 = vpop.permute.xlu0 %1149 }
 0x497   : > { %2072 = vmatprep.subr.mxu1 %v1150_v18 }
 0x498   : > { %2073 = vmatpush3.msra.mxu1 %v1150_v18 }
 0x499   : > { %2074 = vmatprep.subr.mxu1 %v1148_v17 }
 0x49a   : > { %2075 = vmatpush3.msra.mxu1 %v1148_v17  ;;  %v1235_v24 = vpop.permute.xlu0 %1234 }
 0x49b   : > { %2079 = vmatprep.subr.msk.mxu1 %vm638_vm1, %v1241_v19 }
 0x49c   : > { %v2213_v20 = vpop.eup %2212 }
 0x49d   : > { %v1146_v23 = vmul.f32 %v2213_v20, %v2209_v8 }
 0x4a0   : > { %v2215_v21 = vpop.eup %2214 }
 0x4a1   : > { %v1144_v22 = vmul.f32 %v2215_v21, %v2211_v10  ;;  %v2217_v45 = vpop.eup %2216 }
 0x4a2   : > { %v740_v49 = vsel %vm724_vm2, %v2217_v45, 0.0 }
 0x4a3   : > { %2076 = vmatprep.mubr.msk.f32.mxu1 %vm724_vm2, %v1144_v22 }
 0x4a4   : > { %2077 = vmatmul.mubr.msk.f32.vlgmr.msra.gmra.mxu1 %vm724_vm2, %v1146_v23 }
 0x4a5   : > { %2080 = vmatpush3.xpose.msk.msra.mxu1 %vm638_vm1, %v1241_v19  ;;  %2083 = vmatprep.mubr.msk.f32.mxu1 %vm638_vm1, %v1235_v24 }
 0x4a6   : > { %2081 = vmatprep.subr.msk.mxu1 %vm638_vm1, %v1239_v25 }
 0x4a9   : > { %2082 = vmatpush3.xpose.msk.msra.mxu1 %vm638_vm1, %v1239_v25 }
 0x4ac   : > { %2084 = vmatmul.mubr.msk.f32.vlgmr.msra.gmra.mxu1 %vm638_vm1, %v1237_v26 }
 0x4cb   : > { %v727_v27 = vpop.xlane.xlu0 %726 }
 0x4cc   : > { %v731_v32 = vsub.f32 %v2529_v56, %v727_v27 }
 0x4ce   : > { %v733_v35 = vmul.f32 1.442695, %v731_v32  ;;  %v1465_v32 = vld [vmem:[%s2761_s6] sm:$0xff] }
 0x4cf   : > { %v927_v28 = vpop.xlane.xlu0 %926 }
 0x4d0   : > { %v931_v36 = vsub.f32 %v2533_v58, %v927_v28  ;;  %2218 = vpow2.f32 %v733_v35 }
 0x4d2   : > { %v933_v38 = vmul.f32 1.442695, %v931_v36 }
 0x4d3   : > { %v930_v31 = vpop.xlane.xlu0 %929 }
 0x4d4   : > { %v932_v34 = vsub.f32 %v2531_v57, %v930_v31  ;;  %v1466_v31 = vld [vmem:[%s2761_s6 + $0x8] sm:$0xff] }
 0x4d6   : > { %v935_v37 = vmul.f32 1.442695, %v932_v34 }
 0x4d8   : > { %2220 = vpow2.f32 %v935_v37 }
 0x4d9   : > { %2222 = vpow2.f32 %v933_v38 }
 0x4dd   : > { %v2219_v48 = vpop.eup %2218 }
 0x4de   : > { %v737_v51 = vsel %vm724_vm2, %v2219_v48, 0.0 }
 0x4e5   : > { %v2221_v50 = vpop.eup %2220 }
 0x4e6   : > { %v2223_v52 = vpop.eup %2222  ;;  %v940_v53 = vsel %vm724_vm2, %v2221_v50, 0.0 }
 0x4e7   : > { %v937_v54 = vsel %vm724_vm2, %v2223_v52, 0.0 }
 0x564   : > { %v2564_v39 = vpop.f32.mrf.mxu1 }
 0x566   : > { %v2566_v41 = vpop.f32.mrf.mxu1 }
 0x56c   : > { %v2085_v43 = vpop.f32.mrf.mxu1 }
 0x56d   : > { %v1328_v44 = vsel %vm724_vm2, %v2085_v43, -inf }
 0x56e   : > { %1329 = vmax.xlane.f32.xlu1 %v1328_v44  ;;  %v1316_v46 = vpop.f32.mrf.mxu1 }
 0x56f   : > { %v1325_v47 = vsel %vm724_vm2, %v1316_v46, -inf }
 0x570   : > { %1326 = vmax.xlane.f32.xlu0 %v1325_v47 }
 0x572   : > { %741 = vadd.xlane.f32.xlu1 %v740_v49  ;;  %v1941_v49 = vld [vmem:[%s2762_s7] ss:$0 sm:$0xff] }
 0x574   : > { %738 = vadd.xlane.f32.xlu0 %v737_v51 }
 0x576   : > { %941 = vadd.xlane.f32.xlu1 %v940_v53 }
 0x578   : > { %938 = vadd.xlane.f32.xlu0 %v937_v54 }
 0x587   : > { %747 = vrot.lane.b32.xlu1 %v2494_v42, %s2318_s20 }
 0x58b   : > { %949 = vrot.lane.b32.xlu1 %v2492_v40, %s2319_s21 }
 0x58e   : > { %749 = vrot.lane.b32.xlu0 %v2492_v40, %s2318_s20 }
 0x58f   : > { %947 = vrot.lane.b32.xlu1 %v2494_v42, %s2319_s21 }
 0x5f7   : > { %v1330_v55 = vpop.xlane.xlu1 %1329 }
 0x5f8   : > { %v1332_v56 = vsub.f32 %v2085_v43, %v1330_v55 }
 0x5f9   : > { %v1327_v57 = vpop.xlane.xlu0 %1326 }
 0x5fa   : > { %v1335_v58 = vmul.f32 1.442695, %v1332_v56  ;;  %v1331_v59 = vsub.f32 %v1316_v46, %v1327_v57 }
 0x5fb   : > { %v742_v60 = vpop.xlane.xlu1 %741 }
 0x5fc   : > { %2224 = vpow2.f32 %v1335_v58  ;;  %v1333_v61 = vmul.f32 1.442695, %v1331_v59 }
 0x5fd   : > { %2226 = vrcp.f32 %v742_v60  ;;  %v739_v62 = vpop.xlane.xlu0 %738 }
 0x5fe   : > { %2228 = vpow2.f32 %v1333_v61 }
 0x5ff   : > { %2230 = vrcp.f32 %v739_v62  ;;  %v942_v63 = vpop.xlane.xlu1 %941 }
 0x600   : > { %2232 = vrcp.f32 %v942_v63 }
 0x601   : > { %v939_v0 = vpop.xlane.xlu0 %938 }
 0x602   : > { %2234 = vrcp.f32 %v939_v0 }
 0x603   : > { %v748_v1 = vpop.permute.xlu1 %747 }
 0x605   : > { %v750_v2 = vpop.permute.xlu0 %749 }
 0x606   : > { %2044 = vmatprep.subr.mxu0 %v750_v2 }
 0x607   : > { %2045 = vmatpush3.msra.mxu0 %v750_v2  ;;  %v950_v6 = vpop.permute.xlu1 %949  ;;  %v1606_v2 = vld [vmem:[%s2765_s10 + $0x18] sm:$0xff] }
 0x608   : > { %2046 = vmatprep.subr.mxu0 %v748_v1  ;;  %2104 = vmatprep.subr.mxu1 %v1606_v2 }
 0x609   : > { %v2225_v4 = vpop.eup %2224  ;;  %2047 = vmatpush3.msra.mxu0 %v748_v1  ;;  %2105 = vmatpush3.msra.mxu1 %v1606_v2 }
 0x60a   : > { %v2227_v7 = vpop.eup %2226  ;;  %2058 = vmatprep.subr.mxu0 %v950_v6  ;;  %v1340_v8 = vsel %vm724_vm2, %v2225_v4, 0.0 }
 0x60b   : > { %v2229_v9 = vpop.eup %2228  ;;  %1341 = vadd.xlane.f32.xlu1 %v1340_v8  ;;  %v746_v14 = vmul.f32 %v2227_v7, %v2217_v45  ;;  %v948_v17 = vpop.permute.xlu1 %947  ;;  %v1603_v7 = vld [vmem:[%s2765_s10] sm:$0xff] }
 0x60c   : > { %v2231_v10 = vpop.eup %2230  ;;  %v1337_v11 = vsel %vm724_vm2, %v2229_v9, 0.0 }
 0x60d   : > { %1338 = vadd.xlane.f32.xlu0 %v1337_v11  ;;  %v744_v12 = vmul.f32 %v2231_v10, %v2219_v48  ;;  %v2233_v13 = vpop.eup %2232 }
 0x60e   : > { %v946_v18 = vmul.f32 %v2233_v13, %v2221_v50 }
 0x60f   : > { %v2235_v15 = vpop.eup %2234  ;;  %2048 = vmatprep.mubr.msk.f32.mxu0 %vm724_vm2, %v744_v12 }
 0x610   : > { %2049 = vmatmul.mubr.msk.f32.vlgmr.msra.gmra.mxu0 %vm724_vm2, %v746_v14  ;;  %v944_v16 = vmul.f32 %v2235_v15, %v2223_v52  ;;  %v1944_v15 = vld [vmem:[%s2763_s8] ss:$0 sm:$0xff] }
 0x611   : > { %2059 = vmatpush3.msra.mxu0 %v950_v6  ;;  %v1604_v6 = vld [vmem:[%s2765_s10 + $0x8] sm:$0xff] }
 0x612   : > { %2060 = vmatprep.subr.mxu0 %v948_v17  ;;  %2062 = vmatprep.mubr.msk.f32.mxu0 %vm724_vm2, %v944_v16 }
 0x613   : > { %2061 = vmatpush3.msra.mxu0 %v948_v17  ;;  %v1945_v17 = vld [vmem:[%s2764_s9] ss:$0 sm:$0xff] }
 0x614   : > { %2063 = vmatmul.mubr.msk.f32.vlgmr.msra.gmra.mxu0 %vm724_vm2, %v946_v18 }
 0x61c   : > { %1347 = vrot.lane.b32.xlu1 %v2494_v42, %s2320_s22 }
 0x623   : > { %1349 = vrot.lane.b32.xlu0 %v2492_v40, %s2320_s22 }
 0x694   : > { %v1342_v19 = vpop.xlane.xlu1 %1341 }
 0x695   : > { %2236 = vrcp.f32 %v1342_v19 }
 0x696   : > { %v1339_v20 = vpop.xlane.xlu0 %1338 }
 0x697   : > { %2238 = vrcp.f32 %v1339_v20 }
 0x698   : > { %v1348_v22 = vpop.permute.xlu1 %1347 }
 0x69a   : > { %v1350_v21 = vpop.permute.xlu0 %1349 }
 0x69b   : > { %2086 = vmatprep.subr.mxu0 %v1350_v21 }
 0x69c   : > { %2087 = vmatpush3.msra.mxu0 %v1350_v21 }
 0x69d   : > { %2088 = vmatprep.subr.mxu0 %v1348_v22 }
 0x69e   : > { %2089 = vmatpush3.msra.mxu0 %v1348_v22 }
 0x69f   : > { %2093 = vmatprep.subr.mxu0 %v1468_v29 }
 0x6a2   : > { %v2237_v23 = vpop.eup %2236 }
 0x6a3   : > { %v1346_v26 = vmul.f32 %v2237_v23, %v2225_v4  ;;  %v1605_v4 = vld [vmem:[%s2765_s10 + $0x10] sm:$0xff] }
 0x6a4   : > { %v2239_v24 = vpop.eup %2238  ;;  %2106 = vmatprep.subr.mxu1 %v1605_v4 }
 0x6a5   : > { %v1344_v25 = vmul.f32 %v2239_v24, %v2229_v9  ;;  %2107 = vmatpush3.msra.mxu1 %v1605_v4  ;;  %v1728_v24 = vld [vmem:[%s2767_s12 + $0x78] sm:$0xff] }
 0x6a6   : > { %2108 = vmatprep.subr.mxu1 %v1604_v6 }
 0x6a7   : > { %2090 = vmatprep.mubr.msk.f32.mxu0 %vm724_vm2, %v1344_v25  ;;  %2109 = vmatpush3.msra.mxu1 %v1604_v6  ;;  %v1727_v25 = vld [vmem:[%s2767_s12 + $0x70] sm:$0xff] }
 0x6a8   : > { %2091 = vmatmul.mubr.msk.f32.vlgmr.msra.gmra.mxu0 %vm724_vm2, %v1346_v26  ;;  %2110 = vmatprep.subr.mxu1 %v1603_v7  ;;  %v1726_v26 = vld [vmem:[%s2767_s12 + $0x68] sm:$0xff] }
 0x6a9   : > { %2094 = vmatpush3.msra.mxu0 %v1468_v29  ;;  %2111 = vmatpush3.msra.mxu1 %v1603_v7  ;;  %v1721_v29 = vld [vmem:[%s2767_s12 + $0x40] sm:$0xff] }
 0x6aa   : > { %2095 = vmatprep.subr.mxu0 %v1467_v30 }
 0x6ab   : > { %2096 = vmatpush3.msra.mxu0 %v1467_v30  ;;  %v1720_v30 = vld [vmem:[%s2767_s12 + $0x38] sm:$0xff] }
 0x6ac   : > { %2097 = vmatprep.subr.mxu0 %v1466_v31 }
 0x6ad   : > { %2098 = vmatpush3.msra.mxu0 %v1466_v31  ;;  %v1719_v31 = vld [vmem:[%s2767_s12 + $0x30] sm:$0xff] }
 0x6ae   : > { %2099 = vmatprep.subr.mxu0 %v1465_v32 }
 0x6af   : > { %2100 = vmatpush3.msra.mxu0 %v1465_v32  ;;  %v1718_v32 = vld [vmem:[%s2767_s12 + $0x28] sm:$0xff] }
 0x6b0   : > { %2115 = vmatprep.subr.mxu0 %v1728_v24 }
 0x6d0   : > { %v2050_v42 = vpop.f32.mrf.mxu0 }
 0x6d2   : > { %v825_v40 = vpop.f32.mrf.mxu0 }
 0x6d4   : > { %v2064_v27 = vpop.f32.mrf.mxu0 }
 0x6d5   : > { %1438 = vrot.lane.b32.xlu1 %v2064_v27, %s2770_s25  ;;  %v1723_v27 = vld [vmem:[%s2767_s12 + $0x50] sm:$0xff] }
 0x6d6   : > { %v1025_v28 = vpop.f32.mrf.mxu0 }
 0x6d7   : > { %1436 = vrot.lane.b32.xlu0 %v1025_v28, %s2770_s25  ;;  %v1722_v28 = vld [vmem:[%s2767_s12 + $0x48] sm:$0xff]  ;;  %s473_s25 = sand.u32 1, %s2300_s30  }
 0x6d8   : > { %s1907_s28 = sshll.u32 %s473_s25, 4 }
 0x6d9   : > { %1446 = vrot.lane.b32.xlu1 %v2564_v39, %s2322_s26  ;;  %s475_s21 = scalar_lea.vmem [#allocation2], %s1907_s28 }
 0x6da   : > { %s1829_s22 = sshll.u32 %s475_s21, 4  ;;  %s2704_s22 = int_to_ptr.vmem [resolvable:$true] %s1829_s22 }
 0x6db   : > { %1444 = vrot.lane.b32.xlu0 %v2566_v41, %s2322_s26  ;;  %s1957_s26 = sshll.u32 %s2422_s17, 8  ;;  %s2714_s17 = scalar_lea.sflag [#allocation3], %s473_s25 }
 0x6dc   : > { %s2711_s20 = scalar_lea.hbm %s2769_s14, %s1957_s26  ;;  %s2248_s28 = scalar_lea.vmem %s2704_s22, 256 }
 0x6dd   : > { %p2249_p11 = scmp.ne.s32.totalorder %s2704_s22, %s2248_s28  ;;  %p2255_p0 = scmp.lt.s32.totalorder %s2704_s22, %s2253_s1 }
 0x6de   : > { %p2256_p1 = scmp.lt.s32.totalorder %s2254_s2, %s2248_s28 }
 0x6df   : > { %p2250_p12 = pnand %p2249_p11, %p2439_p5 }
 0x6e0   : > { %p2257_p2 = por %p2256_p1, %p2255_p0 }
 0x6e1   : > { %p2251_p13 = pneg %p2250_p12 }
 0x6e3   : > { %p2258_p3 = pnand %p2257_p2, %p2251_p13 }
 0x747   : > { %v1439_v35 = vpop.permute.xlu1 %1438 }
 0x748   : > { %v1459_v43 = vsel %vm638_vm1, %v2050_v42, %v1439_v35  ;;  %v1725_v42 = vld [vmem:[%s2767_s12 + $0x60] sm:$0xff]  ;;  %v1715_v35 = vld [vmem:[%s2767_s12 + $0x10] sm:$0xff] }
 0x749   : > { %v1437_v36 = vpop.permute.xlu0 %1436 }
 0x74a   : > { %v1458_v39 = vsel %vm638_vm1, %v825_v40, %v1437_v36  ;;  %v1724_v40 = vld [vmem:[%s2767_s12 + $0x58] sm:$0xff]  ;;  %v1714_v36 = vld [vmem:[%s2767_s12 + $0x8] sm:$0xff] }
 0x74b   : > { %v1447_v37 = vpop.permute.xlu1 %1446 }
 0x74c   : > { %v1461_v46 = vsel %vm724_vm2, %v1459_v43, %v1447_v37  ;;  %v1713_v37 = vld [vmem:[%s2767_s12] sm:$0xff] }
 0x74d   : > { %v1445_v38 = vpop.permute.xlu0 %1444 }
 0x74e   : > { %v1460_v44 = vsel %vm724_vm2, %v1458_v39, %v1445_v38  ;;  %v1946_v38 = vld [vmem:[%s2766_s11] ss:$0 sm:$0xff] }
 0x768   : > { %v2092_v33 = vpop.f32.mrf.mxu0 }
 0x769   : > { %1454 = vrot.lane.b32.xlu1 %v2092_v33, %s2323_s27  ;;  %v1717_v33 = vld [vmem:[%s2767_s12 + $0x20] sm:$0xff] }
 0x76a   : > { %v1425_v34 = vpop.f32.mrf.mxu0 }
 0x76b   : > { %1452 = vrot.lane.b32.xlu0 %v1425_v34, %s2323_s27  ;;  %v1716_v34 = vld [vmem:[%s2767_s12 + $0x18] sm:$0xff] }
 0x7db   : > { %v1455_v41 = vpop.permute.xlu1 %1454 }
 0x7dc   : > { %v1464_v48 = vsel %vm1462_vm3, %v1461_v46, %v1455_v41 }
 0x7dd   : > { %v1453_v45 = vpop.permute.xlu0 %1452 }
 0x7de   : > { %v1463_v47 = vsel %vm1462_vm3, %v1460_v44, %v1453_v45 }
 0x7df   : > { %2101 = vmatprep.mubr.msk.f32.mxu0 %vm494_vm0, %v1463_v47 }
 0x7e0   : > { %2102 = vmatmul.mubr.msk.f32.vlgmr.msra.gmra.mxu0 %vm494_vm0, %v1464_v48 }
 0x7e1   : > { %2116 = vmatpush3.msra.mxu0 %v1728_v24 }
 0x7e2   : > { %2117 = vmatprep.subr.mxu0 %v1727_v25 }
 0x7e3   : > { %2118 = vmatpush3.msra.mxu0 %v1727_v25 }
 0x7e4   : > { %2119 = vmatprep.subr.mxu0 %v1726_v26 }
 0x7e5   : > { %2120 = vmatpush3.msra.mxu0 %v1726_v26 }
 0x7e6   : > { %2121 = vmatprep.subr.mxu0 %v1725_v42 }
 0x7e7   : > { %2122 = vmatpush3.msra.mxu0 %v1725_v42 }
 0x7e8   : > { %2123 = vmatprep.subr.mxu0 %v1724_v40 }
 0x7e9   : > { %2124 = vmatpush3.msra.mxu0 %v1724_v40 }
 0x7ea   : > { %2125 = vmatprep.subr.mxu0 %v1723_v27 }
 0x7eb   : > { %2126 = vmatpush3.msra.mxu0 %v1723_v27 }
 0x7ec   : > { %2127 = vmatprep.subr.mxu0 %v1722_v28 }
 0x7ed   : > { %2128 = vmatpush3.msra.mxu0 %v1722_v28 }
 0x7ee   : > { %2129 = vmatprep.subr.mxu0 %v1721_v29 }
 0x7ef   : > { %2130 = vmatpush3.msra.mxu0 %v1721_v29 }
 0x7f0   : > { %2131 = vmatprep.subr.mxu0 %v1720_v30 }
 0x7f1   : > { %2132 = vmatpush3.msra.mxu0 %v1720_v30 }
 0x7f2   : > { %2133 = vmatprep.subr.mxu0 %v1719_v31 }
 0x7f3   : > { %2134 = vmatpush3.msra.mxu0 %v1719_v31 }
 0x7f4   : > { %2135 = vmatprep.subr.mxu0 %v1718_v32 }
 0x7f5   : > { %2136 = vmatpush3.msra.mxu0 %v1718_v32 }
 0x7f6   : > { %2137 = vmatprep.subr.mxu0 %v1717_v33 }
 0x7f7   : > { %2138 = vmatpush3.msra.mxu0 %v1717_v33 }
 0x7f8   : > { %2139 = vmatprep.subr.mxu0 %v1716_v34 }
 0x7f9   : > { %2140 = vmatpush3.msra.mxu0 %v1716_v34 }
 0x7fa   : > { %2141 = vmatprep.subr.mxu0 %v1715_v35 }
 0x7fb   : > { %2142 = vmatpush3.msra.mxu0 %v1715_v35 }
 0x7fc   : > { %2143 = vmatprep.subr.mxu0 %v1714_v36 }
 0x7fd   : > { %2144 = vmatpush3.msra.mxu0 %v1714_v36 }
 0x7fe   : > { %2145 = vmatprep.subr.mxu0 %v1713_v37 }
 0x7ff   : > { %2146 = vmatpush3.msra.mxu0 %v1713_v37 }
 0x8a0   : > { %v2103_v50 = vpop.f32.mrf.mxu0 }
 0x8a1   : > { %v1554_v51 = vadd.f32 %v2103_v50, %v1941_v49 }
 0x8a2   : > { %v1548_v52 = vpop.f32.mrf.mxu0 }
 0x8a3   : > { %v2614_v53 = vadd.f32 %v1554_v51, %v2459_v5  ;;  %v1549_v54 = vadd.f32 %v1941_v49, %v1548_v52 }
 0x8a5   : > { %v2617_v55 = vadd.f32 %v1549_v54, %v2457_v3  ;;  %v1564_v56 = vsel %vm494_vm0, %v2614_v53, 0.0 }
 0x8a6   : > { %1565 = vadd.xlane.f32.xlu1 %v1564_v56 }
 0x8a7   : > { %v1561_v57 = vsel %vm494_vm0, %v2617_v55, 0.0 }
 0x8a8   : > { %1562 = vadd.xlane.f32.xlu0 %v1561_v57 }
 0x92f   : > { %v1566_v58 = vpop.xlane.xlu1 %1565 }
 0x930   : > { %v1568_v59 = vmul.f32 0.03125, %v1566_v58 }
 0x931   : > { %v1563_v60 = vpop.xlane.xlu0 %1562 }
 0x932   : > { %v1567_v61 = vmul.f32 0.03125, %v1563_v60  ;;  %v1570_v62 = vsub.f32 %v2614_v53, %v1568_v59 }
 0x934   : > { %v1569_v5 = vsub.f32 %v2617_v55, %v1567_v61  ;;  %v1572_v0 = vmul.f32 %v1570_v62, %v1570_v62 }
 0x936   : > { %v1571_v63 = vmul.f32 %v1569_v5, %v1569_v5  ;;  %v1576_v1 = vsel %vm494_vm0, %v1572_v0, 0.0 }
 0x938   : > { %v1573_v3 = vsel %vm494_vm0, %v1571_v63, 0.0 }
 0x939   : > { %1574 = vadd.xlane.f32.xlu0 %v1573_v3  ;;  %v1949_v3 = vld [vmem:[%s2768_s13] ss:$0 sm:$0xff] }
 0x93d   : > { %1577 = vadd.xlane.f32.xlu0 %v1576_v1 }
 0x9c2   : > { %v1575_v8 = vpop.xlane.xlu0 %1574 }
 0x9c3   : > { %v1579_v9 = vmul.f32 0.03125, %v1575_v8 }
 0x9c5   : > { %v1581_v10 = vadd.f32 1e-05, %v1579_v9 }
 0x9c6   : > { %v1578_v11 = vpop.xlane.xlu0 %1577 }
 0x9c7   : > { %2240 = vrsqrt.f32 %v1581_v10  ;;  %v1580_v12 = vmul.f32 0.03125, %v1578_v11 }
 0x9c9   : > { %v1582_v13 = vadd.f32 1e-05, %v1580_v12 }
 0x9cb   : > { %2242 = vrsqrt.f32 %v1582_v13 }
 0x9d4   : > { %v2241_v14 = vpop.eup %2240 }
 0x9d5   : > { %v1585_v16 = vmul.f32 %v2241_v14, %v1569_v5 }
 0x9d7   : > { %v1593_v18 = vmul.f32 %v1944_v15, %v1585_v16 }
 0x9d8   : > { %v2243_v19 = vpop.eup %2242 }
 0x9d9   : > { %v1586_v20 = vmul.f32 %v2243_v19, %v1570_v62  ;;  %v1601_v21 = vadd.f32 %v1945_v17, %v1593_v18 }
 0x9db   : > { %v1594_v22 = vmul.f32 %v1944_v15, %v1586_v20  ;;  %2112 = vmatprep.mubr.msk.f32.mxu1 %vm494_vm0, %v1601_v21 }
 0x9dd   : > { %v1602_v23 = vadd.f32 %v1945_v17, %v1594_v22 }
 0x9df   : > { %2113 = vmatmul.mubr.msk.f32.vlgmr.msra.gmra.mxu1 %vm494_vm0, %v1602_v23 }
 0xa9f   : > { %v2114_v39 = vpop.f32.mrf.mxu1 }
 0xaa0   : > { %v1692_v41 = vadd.f32 %v2114_v39, %v1946_v38 }
 0xaa1   : > { %v1686_v43 = vpop.f32.mrf.mxu1 }
 0xaa2   : > { %v1698_v44 = vmul.f32 0.044715, %v1692_v41  ;;  %v1687_v45 = vadd.f32 %v1946_v38, %v1686_v43  ;;  %v1696_v62 = vmul.f32 0.5, %v1692_v41 }
 0xaa4   : > { %v1700_v46 = vmul.f32 %v1698_v44, %v1692_v41  ;;  %v1697_v47 = vmul.f32 0.044715, %v1687_v45  ;;  %v1695_v60 = vmul.f32 0.5, %v1687_v45 }
 0xaa6   : > { %v1702_v48 = vmul.f32 %v1700_v46, %v1692_v41  ;;  %v1699_v49 = vmul.f32 %v1697_v47, %v1687_v45 }
 0xaa8   : > { %v1704_v50 = vadd.f32 %v1702_v48, %v1692_v41  ;;  %v1701_v51 = vmul.f32 %v1699_v49, %v1687_v45 }
 0xaaa   : > { %v1703_v52 = vadd.f32 %v1701_v51, %v1687_v45  ;;  %v1706_v54 = vmul.f32 0.7978846, %v1704_v50 }
 0xaac   : > { %v1705_v56 = vmul.f32 0.7978846, %v1703_v52  ;;  %2244 = vtanh.f32 %v1706_v54 }
 0xaae   : > { %2246 = vtanh.f32 %v1705_v56 }
 0xab9   : > { %v2245_v57 = vpop.eup %2244 }
 0xaba   : > { %v1710_v59 = vadd.f32 1.0, %v2245_v57 }
 0xabb   : > { %v2247_v58 = vpop.eup %2246 }
 0xabc   : > { %v1709_v61 = vadd.f32 1.0, %v2247_v58  ;;  %v1712_v63 = vmul.f32 %v1710_v59, %v1696_v62 }
 0xabe   : > { %v1711_v5 = vmul.f32 %v1709_v61, %v1695_v60 }
 0xac0   : > { %2147 = vmatprep.mubr.f32.mxu0 %v1711_v5 }
 0xac1   : > { %2148 = vmatmul.mubr.f32.vlgmr.msra.gmra.mxu0 %v1712_v63 }
 0xb81   : > { %v2149_v0 = vpop.f32.mrf.mxu0 }
 0xb82   : > { %v1808_v1 = vadd.f32 %v2149_v0, %v1949_v3 }
 0xb83   : > { %v1802_v2 = vpop.f32.mrf.mxu0 }
 0xb84   : > { %v1812_v4 = vadd.f32 %v1808_v1, %v2614_v53  ;;  %v1803_v6 = vadd.f32 %v1949_v3, %v1802_v2 }
 0xb86   : > { %1814 = vst.msk [vmem:[%s475_s21 + $0x8] sm:$0xff] %vm494_vm0, %v1812_v4  ;;  %v1811_v7 = vadd.f32 %v1803_v6, %v2617_v55 }
 0xb88   : > { %1813 = vst.msk [vmem:[%s475_s21] sm:$0xff] %vm494_vm0, %v1811_v7 }
 0xb89   : > { %2261 = shalt.err (!%p2258_p3)
}
 0xb8a   : > { %s2262_s25 = scalar_lea.hbm %s2711_s20, 256  ;;  %s2266_s0 = scalar_lea.hbm %s2769_s14, 512 }
 0xb8b   : > { %p2263_p4 = scmp.ne.s32.totalorder %s2711_s20, %s2262_s25  ;;  %p2267_p9 = scmp.lt.s32.totalorder %s2711_s20, %s2769_s14 }
 0xb8c   : > { %p2268_p10 = scmp.lt.s32.totalorder %s2266_s0, %s2262_s25 }
 0xb8d   : > { %p2264_p7 = pnand %p2263_p4, %p2439_p5 }
 0xb8e   : > { %p2269_p11 = por %p2268_p10, %p2267_p9 }
 0xb8f   : > { %p2265_p8 = pneg %p2264_p7 }
 0xb91   : > { %p2270_p12 = pnand %p2269_p11, %p2265_p8 }
 0xb93   : > { %2273 = shalt.err (!%p2270_p12)
}
 0xb94   : > { %s2325_s1 = smov 128   ;;  %s2780_s2 = smov 8  }
 0xb95   : > { %2150 = dma.vmem_to_hbm [thread:$0]  (%p2439_p5), %s2704_s22, 256, %s2711_s20, %s2714_s17, %s2325_s1, %s2325_s1, %s2780_s2  }
 0xb96 PF: > { %p2156_p13 = scmp.ge.s32.totalorder %s2308_s16, 2  ;;  %s1844_s28 = sand.u32 1, %s2296_s29  }
 0xb97   : > { %s1845_s25 = scalar_lea.sflag [#allocation3], %s1844_s28 }
 0xb98   : > { %p2153_p0 = pnand %p2156_p13, %p2443_p6 }
 0xb9a   : > { %p2154_p1 = pneg %p2153_p0 }
 0xb9c   : > { %2291 = dma.done.wait (%p2154_p1), %s1845_s25, 256  }
 0xb9d   : > { %2293 = vsyncadd (%p2154_p1), %s1845_s25, 4294967040  ;;  %s2781_s23 = sld [smem:[#allocation5_spill]]  ;;  %p24_p2 = scmp.ge.s32.totalorder %s2426_s19, 4  }
 0xb9e   : > { %s2782_s29 = smov %s2300_s30  ;;  %s2783_s30 = smov %s2304_s15 }
 0xb9f   : > { %s2785_s16 = smov %s2426_s19  ;;  %26 = sbr.rel (!%p24_p2) target bundleno = 7 (0x7), region = 114 }
 0xba3   : > { %s2784_s15 = smov %s2781_s23 }
 0xba4   :  { %1850 = vsyncpa [#allocation3], 1 }
 0xba5   :  { %1852 = vsyncpa [#allocation3 + $0x1], 1 }

// kernel: _encoder_forward.2
= control target key start
LH: loop header
LB: loop body
LE: loop exit
PB: predicated region body
PF: predicated region fallthrough
CT: control target
= control target key end

     0   :  { %19 = vsyncpa [#allocation3], 0  ;;  %s2738_s0 = inlined_call_operand.vmem [shape: f32[2,16,32], index: 0, kind: input, shape index: {}]   ;;  %s2739_s1 = inlined_call_operand.vmem [shape: f32[2,16,32], index: 1, kind: input, shape index: {}]   ;;  %s2740_s2 = inlined_call_operand.vmem [shape: f32[1,32], index: 2, kind: input, shape index: {}]   ;;  %s2741_s3 = inlined_call_operand.vmem [shape: f32[1,32], index: 3, kind: input, shape index: {}]   ;;  %s2742_s4 = inlined_call_operand.vmem [shape: f32[32,96], index: 4, kind: input, shape index: {}]   ;;  %s2743_s5 = inlined_call_operand.vmem [shape: f32[1,96], index: 5, kind: input, shape index: {}]   ;;  %s2744_s6 = inlined_call_operand.vmem [shape: f32[32,32], index: 6, kind: input, shape index: {}]   ;;  %s2745_s7 = inlined_call_operand.vmem [shape: f32[1,32], index: 7, kind: input, shape index: {}]   ;;  %s2746_s8 = inlined_call_operand.vmem [shape: f32[1,32], index: 8, kind: input, shape index: {}]   ;;  %s2747_s9 = inlined_call_operand.vmem [shape: f32[1,32], index: 9, kind: input, shape index: {}]   ;;  %s2748_s10 = inlined_call_operand.vmem [shape: f32[32,128], index: 10, kind: input, shape index: {}]   ;;  %s2749_s11 = inlined_call_operand.hbm [shape: f32[1,128], index: 11, kind: input, shape index: {}]   ;;  %s2750_s12 = inlined_call_operand.vmem [shape: f32[128,32], index: 12, kind: input, shape index: {}]   ;;  %s2751_s13 = inlined_call_operand.hbm [shape: f32[1,32], index: 13, kind: input, shape index: {}]   ;;  %s2752_s14 = inlined_call_operand.vmem [shape: f32[2,16,32], index: 14, kind: output, shape index: {}]  }
   0x1   :  { %20 = vsyncpa [#allocation5], 0  ;;  %s2428_s29 = smov 0  }
   0x2 LB: > { %s2434_s30 = sadd.s32 4294967295, %s2335_s29   ;;  %p1934_p0 = scmp.ge.s32.totalorder %s2335_s29, 1  ;;  %s2335_s29 = sphi %s2428_s29, %s26_s29  }
   0x3   : > { %p361_p1 = scmp.lt.s32.totalorder %s2335_s29, 3  ;;  %p2753_p2 = scmp.eq.s32.totalorder %s2434_s30, 0 }
   0x4   : > { %s2337_s16 = smov [#allocation2]   ;;  %s2338_s18 = smov [#allocation4]  }
   0x5   : > { %p2439_p3 = pnand %p1934_p0, %p361_p1  ;;  %s401_s17 = sshll.u32 %s2337_s16, 4  ;;  %s402_s17 = int_to_ptr.vmem [resolvable:$true] %s401_s17 }
   0x6   : > { %s415_s19 = sshll.u32 %s2338_s18, 4  ;;  %s2280_s21 = scalar_lea.vmem %s402_s17, 16  ;;  %s416_s19 = int_to_ptr.vmem [resolvable:$true] %s415_s19 }
   0x7   : > { %p2190_p4 = pneg %p2439_p3  ;;  %p2281_p7 = scmp.ne.s32.totalorder %s402_s17, %s2280_s21 }
   0x8   : > { %s2287_s22 = scalar_lea.vmem %s402_s17, 32  ;;  %p2288_p10 = scmp.lt.s32.totalorder %s402_s17, %s402_s17 }
   0x9   : > { %p2447_p5 = pnand %p2753_p2, %p2190_p4  ;;  %p2289_p11 = scmp.lt.s32.totalorder %s2287_s22, %s2280_s21 }
   0xb   : > { %p2271_p6 = pneg %p2447_p5  ;;  %p2290_p12 = por %p2289_p11, %p2288_p10 }
   0xd   : > { %p2283_p8 = pnand %p2281_p7, %p2271_p6 }
   0xf   : > { %p2284_p9 = pneg %p2283_p8 }
  0x11   : > { %p2291_p13 = pnand %p2290_p12, %p2284_p9 }
  0x13   : > { %2294 = shalt.err (!%p2291_p13)
}
  0x14   : > { %2193 = dma.hbm_to_vmem [thread:$0]  (!%p2447_p5), %s2749_s11, 16, %s402_s17, [#allocation3]  }
  0x15   : > { %s2306_s25 = scalar_lea.vmem %s416_s19, 16  ;;  %s2313_s26 = scalar_lea.vmem %s416_s19, 32 }
  0x16   : > { %p2307_p0 = scmp.ne.s32.totalorder %s416_s19, %s2306_s25  ;;  %p2314_p7 = scmp.lt.s32.totalorder %s416_s19, %s416_s19 }
  0x17   : > { %p2315_p8 = scmp.lt.s32.totalorder %s2313_s26, %s2306_s25 }
  0x18   : > { %p2309_p1 = pnand %p2307_p0, %p2271_p6 }
  0x19   : > { %p2316_p2 = por %p2315_p8, %p2314_p7 }
  0x1a   : > { %p2310_p4 = pneg %p2309_p1 }
  0x1c   : > { %p2317_p10 = pnand %p2316_p2, %p2310_p4 }
  0x1e   : > { %2320 = shalt.err (!%p2317_p10)
}
  0x1f   : > { %2196 = dma.hbm_to_vmem [thread:$0]  (!%p2447_p5), %s2751_s13, 16, %s416_s19, [#allocation5]  }
  0x20   : > { %444 = sbr.rel (%p2439_p3) target bundleno = 2972 (0xb9c), region = 76  ;;  %p2756_p9 = scmp.eq.s32.totalorder (!%p2439_p3), %s2434_s30, 0 }
  0x25   : > { %2326 = dma.done.wait (%p2756_p9), [#allocation3], 16   ;;  %p2757_p6 = pmov %p2756_p9 }
  0x27   : > { %2328 = vsyncadd (%p2757_p6), [#allocation3], 4294967280  ;;  %p2758_p11 = pmov %p2757_p6 }
  0x28   : > { %p2759_p2 = pmov %p2757_p6 }
  0x29   : > { %2330 = dma.done.wait (%p2758_p11), [#allocation5], 16  }
  0x2a   : > { %2332 = vsyncadd (%p2759_p2), [#allocation5], 4294967280  ;;  %p499_p12 = scmp.lt.s32.totalorder %s2434_s30, 1  ;;  %vm522_vm0 = vcmask 261120   ;;  %v569_v18 = vld [vmem:[%s2742_s4 + $0x18] sm:$0xff]  ;;  %v568_v19 = vld [vmem:[%s2742_s4 + $0x10] sm:$0xff] }
  0x2b   : > { %2058 = vmatprep.subr.mxu1 %v569_v18  ;;  %v567_v20 = vld [vmem:[%s2742_s4 + $0x8] sm:$0xff]  ;;  %v566_v21 = vld [vmem:[%s2742_s4] sm:$0xff]  ;;  %vm666_vm1 = vcmask 64512   ;;  %s2340_s22 = smov 120   ;;  %s2341_s23 = smov 88   ;;  %vm752_vm2 = vcmask 130048  }
  0x2c   : > { %s2761_s30 = smov (!%p499_p12, %s2434_s30), 1  ;;  %2059 = vmatpush3.msra.mxu1 %v569_v18  ;;  %v1947_v29 = vld [vmem:[%s2740_s2] ss:$0 sm:$0xff]  ;;  %s2342_s24 = smov 112   ;;  %vm1490_vm3 = vcmask 195584  }
  0x2d   : > { %s2481_s16 = sshll.u32 %s2761_s30, 4  ;;  %2060 = vmatprep.subr.mxu1 %v568_v19  ;;  %v1948_v31 = vld [vmem:[%s2741_s3] ss:$0 sm:$0xff]  ;;  %s2339_s30 = smov 96  }
  0x2e   : > { %s503_s18 = scalar_lea.vmem %s2738_s0, %s2481_s16  ;;  %s508_s21 = scalar_lea.vmem %s2739_s1, %s2481_s16  ;;  %2061 = vmatpush3.msra.mxu1 %v568_v19  ;;  %v1949_v38 = vld [vmem:[%s2743_s5] ss:$0 sm:$0xff] }
  0x2f   : > { %v514_v0 = vld [vmem:[%s503_s18] sm:$0xff]  ;;  %v515_v2 = vld [vmem:[%s503_s18 + $0x8] sm:$0xff]  ;;  %2062 = vmatprep.subr.mxu1 %v567_v20  ;;  %s2343_s25 = smov 80   ;;  %s2344_s26 = smov 48  }
  0x30   : > { %v516_v1 = vld [vmem:[%s508_s21] sm:$0xff]  ;;  %v517_v4 = vld [vmem:[%s508_s21 + $0x8] sm:$0xff]  ;;  %2063 = vmatpush3.msra.mxu1 %v567_v20  ;;  %s2345_s27 = smov 72   ;;  %s2346_s28 = smov 104  }
  0x31   : > { %v2491_v3 = vadd.f32 %v516_v1, %v514_v0  ;;  %v2493_v5 = vadd.f32 %v517_v4, %v515_v2  ;;  %2064 = vmatprep.subr.mxu1 %v566_v21  ;;  %s2347_s15 = smov 64   ;;  %s2348_s17 = smov 56  }
  0x32   : > { %2065 = vmatpush3.msra.mxu1 %v566_v21  ;;  %s2349_s18 = smov 40   ;;  %s2350_s19 = smov 8  }
  0x33   : > { %v523_v6 = vsel %vm522_vm0, %v2491_v3, 0.0  ;;  %v526_v7 = vsel %vm522_vm0, %v2493_v5, 0.0  ;;  %s2351_s20 = smov 16  }
  0x34   : > { %524 = vadd.xlane.f32.xlu0 %v523_v6 }
  0x38   : > { %527 = vadd.xlane.f32.xlu0 %v526_v7 }
  0xbd   : > { %v525_v8 = vpop.xlane.xlu0 %524 }
  0xbe   : > { %v530_v9 = vmul.f32 0.03125, %v525_v8 }
  0xc0   : > { %v532_v10 = vsub.f32 %v2491_v3, %v530_v9 }
  0xc1   : > { %v528_v11 = vpop.xlane.xlu0 %527 }
  0xc2   : > { %v531_v12 = vmul.f32 0.03125, %v528_v11  ;;  %v534_v13 = vmul.f32 %v532_v10, %v532_v10 }
  0xc4   : > { %v533_v14 = vsub.f32 %v2493_v5, %v531_v12  ;;  %v536_v15 = vsel %vm522_vm0, %v534_v13, 0.0 }
  0xc5   : > { %537 = vadd.xlane.f32.xlu1 %v536_v15 }
  0xc6   : > { %v535_v16 = vmul.f32 %v533_v14, %v533_v14 }
  0xc8   : > { %v539_v17 = vsel %vm522_vm0, %v535_v16, 0.0 }
  0xc9   : > { %540 = vadd.xlane.f32.xlu1 %v539_v17 }
 0x14e   : > { %v538_v22 = vpop.xlane.xlu1 %537 }
 0x14f   : > { %v542_v23 = vmul.f32 0.03125, %v538_v22 }
 0x151   : > { %v544_v24 = vadd.f32 1e-05, %v542_v23 }
 0x152   : > { %v541_v25 = vpop.xlane.xlu1 %540 }
 0x153   : > { %2225 = vrsqrt.f32 %v544_v24  ;;  %v543_v26 = vmul.f32 0.03125, %v541_v25 }
 0x155   : > { %v545_v27 = vadd.f32 1e-05, %v543_v26 }
 0x157   : > { %2227 = vrsqrt.f32 %v545_v27 }
 0x160   : > { %v2226_v28 = vpop.eup %2225 }
 0x161   : > { %v548_v30 = vmul.f32 %v2226_v28, %v532_v10 }
 0x163   : > { %v556_v32 = vmul.f32 %v1947_v29, %v548_v30 }
 0x164   : > { %v2228_v33 = vpop.eup %2227 }
 0x165   : > { %v549_v34 = vmul.f32 %v2228_v33, %v533_v14  ;;  %v564_v35 = vadd.f32 %v1948_v31, %v556_v32 }
 0x167   : > { %v557_v36 = vmul.f32 %v1947_v29, %v549_v34  ;;  %2066 = vmatprep.mubr.msk.f32.mxu1 %vm522_vm0, %v564_v35 }
 0x169   : > { %v565_v37 = vadd.f32 %v1948_v31, %v557_v36 }
 0x16b   : > { %2067 = vmatmul.mubr.msk.f32.vlgmr.msra.gmra.mxu1 %vm522_vm0, %v565_v37 }
 0x22b   : > { %v2068_v39 = vpop.f32.mrf.mxu1 }
 0x22c   : > { %v2526_v40 = vadd.f32 %v2068_v39, %v1949_v38 }
 0x22d   : > { %v649_v41 = vpop.f32.mrf.mxu1 }
 0x22e   : > { %v2528_v42 = vadd.f32 %v1949_v38, %v649_v41  ;;  %664 = vrot.lane.b32.xlu0 %v2526_v40, %s2339_s30  ;;  %v659_v44 = vmul.f32 0.35355338, %v2526_v40 }
 0x230   : > { %662 = vrot.lane.b32.xlu1 %v2528_v42, %s2339_s30  ;;  %v2533_v43 = vmul.f32 0.35355338, %v2528_v42  ;;  %s513_s30 = scalar_lea.vmem %s2752_s14, %s2481_s16 }
 0x232   : > { %862 = vrot.lane.b32.xlu0 %v2533_v43, %s2340_s22  ;;  %2073 = vmatprep.mubr.msk.f32.mxu1 %vm666_vm1, %v2533_v43 }
 0x234   : > { %868 = vrot.lane.b32.xlu1 %v2526_v40, %s2341_s23 }
 0x236   : > { %864 = vrot.lane.b32.xlu0 %v659_v44, %s2340_s22 }
 0x238   : > { %866 = vrot.lane.b32.xlu1 %v2528_v42, %s2341_s23 }
 0x23a   : > { %1062 = vrot.lane.b32.xlu0 %v2533_v43, %s2342_s24 }
 0x23c   : > { %1068 = vrot.lane.b32.xlu1 %v2526_v40, %s2343_s25 }
 0x240   : > { %1066 = vrot.lane.b32.xlu1 %v2528_v42, %s2343_s25 }
 0x244   : > { %1064 = vrot.lane.b32.xlu1 %v659_v44, %s2342_s24 }
 0x2a0   : > { %v665_v45 = vpop.permute.xlu0 %664 }
 0x2a1   : > { %2069 = vmatprep.subr.msk.mxu1 %vm666_vm1, %v665_v45 }
 0x2a2   : > { %2070 = vmatpush3.xpose.msk.msra.mxu1 %vm666_vm1, %v665_v45  ;;  %v663_v46 = vpop.permute.xlu1 %662 }
 0x2a3   : > { %2071 = vmatprep.subr.msk.mxu1 %vm666_vm1, %v663_v46 }
 0x2a4   : > { %v863_v47 = vpop.permute.xlu0 %862 }
 0x2a6   : > { %2072 = vmatpush3.xpose.msk.msra.mxu1 %vm666_vm1, %v663_v46  ;;  %v869_v48 = vpop.permute.xlu1 %868 }
 0x2a7   : > { %2083 = vmatprep.subr.msk.mxu1 %vm666_vm1, %v869_v48 }
 0x2a8   : > { %v865_v50 = vpop.permute.xlu0 %864 }
 0x2a9   : > { %2074 = vmatmul.mubr.msk.f32.vlgmr.msra.gmra.mxu1 %vm666_vm1, %v659_v44 }
 0x2aa   : > { %v867_v49 = vpop.permute.xlu1 %866  ;;  %2084 = vmatpush3.xpose.msk.msra.mxu1 %vm666_vm1, %v869_v48  ;;  %2087 = vmatprep.mubr.msk.f32.mxu1 %vm666_vm1, %v863_v47 }
 0x2ab   : > { %2085 = vmatprep.subr.msk.mxu1 %vm666_vm1, %v867_v49 }
 0x2ac   : > { %v1063_v52 = vpop.permute.xlu0 %1062 }
 0x2ae   : > { %v1069_v51 = vpop.permute.xlu1 %1068  ;;  %2086 = vmatpush3.xpose.msk.msra.mxu1 %vm666_vm1, %v867_v49 }
 0x2af   : > { %2097 = vmatprep.subr.msk.mxu1 %vm666_vm1, %v1069_v51 }
 0x2b1   : > { %2088 = vmatmul.mubr.msk.f32.vlgmr.msra.gmra.mxu1 %vm666_vm1, %v865_v50 }
 0x2b2   : > { %v1067_v53 = vpop.permute.xlu1 %1066  ;;  %2098 = vmatpush3.xpose.msk.msra.mxu1 %vm666_vm1, %v1069_v51  ;;  %2101 = vmatprep.mubr.msk.f32.mxu1 %vm666_vm1, %v1063_v52 }
 0x2b3   : > { %2099 = vmatprep.subr.msk.mxu1 %vm666_vm1, %v1067_v53 }
 0x2b6   : > { %2100 = vmatpush3.xpose.msk.msra.mxu1 %vm666_vm1, %v1067_v53  ;;  %v1065_v54 = vpop.permute.xlu1 %1064 }
 0x2b9   : > { %2102 = vmatmul.mubr.msk.f32.vlgmr.msra.gmra.mxu1 %vm666_vm1, %v1065_v54 }
 0x369   : > { %v2561_v55 = vpop.f32.mrf.mxu1 }
 0x36a   : > { %v756_v63 = vsel %vm752_vm2, %v2561_v55, -inf }
 0x36b   : > { %v2563_v56 = vpop.f32.mrf.mxu1 }
 0x36c   : > { %v753_v12 = vsel %vm752_vm2, %v2563_v56, -inf }
 0x371   : > { %v2565_v57 = vpop.f32.mrf.mxu1 }
 0x372   : > { %v956_v14 = vsel %vm752_vm2, %v2565_v57, -inf }
 0x373   : > { %v2567_v58 = vpop.f32.mrf.mxu1 }
 0x374   : > { %v953_v13 = vsel %vm752_vm2, %v2567_v58, -inf }
 0x379   : > { %v2103_v59 = vpop.f32.mrf.mxu1 }
 0x37a   : > { %v1156_v60 = vsel %vm752_vm2, %v2103_v59, -inf }
 0x37b   : > { %1157 = vmax.xlane.f32.xlu1 %v1156_v60  ;;  %v1144_v61 = vpop.f32.mrf.mxu1 }
 0x37c   : > { %v1153_v62 = vsel %vm752_vm2, %v1144_v61, -inf }
 0x37d   : > { %1154 = vmax.xlane.f32.xlu0 %v1153_v62 }
 0x38c   : > { %1175 = vrot.lane.b32.xlu1 %v2528_v42, %s2344_s26 }
 0x390   : > { %1268 = vrot.lane.b32.xlu1 %v2526_v40, %s2345_s27 }
 0x394   : > { %1266 = vrot.lane.b32.xlu1 %v2528_v42, %s2345_s27 }
 0x398   : > { %1264 = vrot.lane.b32.xlu1 %v659_v44, %s2346_s28 }
 0x3bc   : > { %757 = vmax.xlane.f32.xlu1 %v756_v63 }
 0x404   : > { %v1158_v0 = vpop.xlane.xlu1 %1157 }
 0x405   : > { %v1160_v1 = vsub.f32 %v2103_v59, %v1158_v0 }
 0x406   : > { %v1155_v2 = vpop.xlane.xlu0 %1154 }
 0x407   : > { %v1163_v4 = vmul.f32 1.442695, %v1160_v1  ;;  %v1159_v6 = vsub.f32 %v1144_v61, %v1155_v2 }
 0x408   : > { %v1176_v17 = vpop.permute.xlu1 %1175 }
 0x409   : > { %2229 = vpow2.f32 %v1163_v4  ;;  %v1161_v7 = vmul.f32 1.442695, %v1159_v6 }
 0x40b   : > { %2231 = vpow2.f32 %v1161_v7 }
 0x40c   : > { %v1269_v19 = vpop.permute.xlu1 %1268 }
 0x410   : > { %v1267_v25 = vpop.permute.xlu1 %1266 }
 0x414   : > { %v1265_v26 = vpop.permute.xlu1 %1264 }
 0x416   : > { %v2230_v8 = vpop.eup %2229 }
 0x417   : > { %v1168_v9 = vsel %vm752_vm2, %v2230_v8, 0.0 }
 0x418   : > { %v2232_v10 = vpop.eup %2231  ;;  %1169 = vadd.xlane.f32.xlu0 %v1168_v9 }
 0x419   : > { %v1165_v11 = vsel %vm752_vm2, %v2232_v10, 0.0 }
 0x41c   : > { %1166 = vadd.xlane.f32.xlu0 %v1165_v11 }
 0x432   : > { %1177 = vrot.lane.b32.xlu0 %v2526_v40, %s2344_s26 }
 0x436   : > { %1262 = vrot.lane.b32.xlu0 %v2533_v43, %s2346_s28  ;;  %s2352_s28 = smov 24  }
 0x445   : > { %v758_v29 = vpop.xlane.xlu1 %757 }
 0x446   : > { %v760_v30 = vsub.f32 %v2561_v55, %v758_v29  ;;  %v1496_v29 = vld [vmem:[%s2744_s6 + $0x18] sm:$0xff] }
 0x448   : > { %v763_v33 = vmul.f32 1.442695, %v760_v30  ;;  %v1495_v30 = vld [vmem:[%s2744_s6 + $0x10] sm:$0xff] }
 0x455   : > { %754 = vmax.xlane.f32.xlu0 %v753_v12 }
 0x459   : > { %954 = vmax.xlane.f32.xlu0 %v953_v13 }
 0x45d   : > { %957 = vmax.xlane.f32.xlu0 %v956_v14 }
 0x4a1   : > { %v1170_v15 = vpop.xlane.xlu0 %1169 }
 0x4a2   : > { %2233 = vrcp.f32 %v1170_v15 }
 0x4a5   : > { %v1167_v16 = vpop.xlane.xlu0 %1166 }
 0x4a6   : > { %2235 = vrcp.f32 %v1167_v16 }
 0x4a7   : > { %2237 = vpow2.f32 %v763_v33 }
 0x4a9   : > { %v1178_v18 = vpop.permute.xlu0 %1177 }
 0x4aa   : > { %2104 = vmatprep.subr.mxu1 %v1178_v18 }
 0x4ab   : > { %2105 = vmatpush3.msra.mxu1 %v1178_v18 }
 0x4ac   : > { %2106 = vmatprep.subr.mxu1 %v1176_v17 }
 0x4ad   : > { %2107 = vmatpush3.msra.mxu1 %v1176_v17  ;;  %v1263_v24 = vpop.permute.xlu0 %1262 }
 0x4ae   : > { %2111 = vmatprep.subr.msk.mxu1 %vm666_vm1, %v1269_v19 }
 0x4af   : > { %v2234_v20 = vpop.eup %2233 }
 0x4b0   : > { %v1174_v23 = vmul.f32 %v2234_v20, %v2230_v8 }
 0x4b3   : > { %v2236_v21 = vpop.eup %2235 }
 0x4b4   : > { %v1172_v22 = vmul.f32 %v2236_v21, %v2232_v10  ;;  %v2238_v45 = vpop.eup %2237 }
 0x4b5   : > { %v768_v49 = vsel %vm752_vm2, %v2238_v45, 0.0 }
 0x4b6   : > { %2108 = vmatprep.mubr.msk.f32.mxu1 %vm752_vm2, %v1172_v22 }
 0x4b7   : > { %2109 = vmatmul.mubr.msk.f32.vlgmr.msra.gmra.mxu1 %vm752_vm2, %v1174_v23 }
 0x4b8   : > { %2112 = vmatpush3.xpose.msk.msra.mxu1 %vm666_vm1, %v1269_v19  ;;  %2115 = vmatprep.mubr.msk.f32.mxu1 %vm666_vm1, %v1263_v24 }
 0x4b9   : > { %2113 = vmatprep.subr.msk.mxu1 %vm666_vm1, %v1267_v25 }
 0x4bc   : > { %2114 = vmatpush3.xpose.msk.msra.mxu1 %vm666_vm1, %v1267_v25 }
 0x4bf   : > { %2116 = vmatmul.mubr.msk.f32.vlgmr.msra.gmra.mxu1 %vm666_vm1, %v1265_v26 }
 0x4de   : > { %v755_v27 = vpop.xlane.xlu0 %754 }
 0x4df   : > { %v759_v32 = vsub.f32 %v2563_v56, %v755_v27 }
 0x4e1   : > { %v761_v35 = vmul.f32 1.442695, %v759_v32  ;;  %v1493_v32 = vld [vmem:[%s2744_s6] sm:$0xff] }
 0x4e2   : > { %v955_v28 = vpop.xlane.xlu0 %954 }
 0x4e3   : > { %v959_v36 = vsub.f32 %v2567_v58, %v955_v28  ;;  %2239 = vpow2.f32 %v761_v35 }
 0x4e5   : > { %v961_v38 = vmul.f32 1.442695, %v959_v36 }
 0x4e6   : > { %v958_v31 = vpop.xlane.xlu0 %957 }
 0x4e7   : > { %v960_v34 = vsub.f32 %v2565_v57, %v958_v31  ;;  %v1494_v31 = vld [vmem:[%s2744_s6 + $0x8] sm:$0xff] }
 0x4e9   : > { %v963_v37 = vmul.f32 1.442695, %v960_v34 }
 0x4eb   : > { %2241 = vpow2.f32 %v963_v37 }
 0x4ec   : > { %2243 = vpow2.f32 %v961_v38 }
 0x4f0   : > { %v2240_v48 = vpop.eup %2239 }
 0x4f1   : > { %v765_v51 = vsel %vm752_vm2, %v2240_v48, 0.0 }
 0x4f8   : > { %v2242_v50 = vpop.eup %2241 }
 0x4f9   : > { %v2244_v52 = vpop.eup %2243  ;;  %v968_v53 = vsel %vm752_vm2, %v2242_v50, 0.0 }
 0x4fa   : > { %v965_v54 = vsel %vm752_vm2, %v2244_v52, 0.0 }
 0x577   : > { %v2598_v39 = vpop.f32.mrf.mxu1 }
 0x579   : > { %v2600_v41 = vpop.f32.mrf.mxu1 }
 0x57f   : > { %v2117_v43 = vpop.f32.mrf.mxu1 }
 0x580   : > { %v1356_v44 = vsel %vm752_vm2, %v2117_v43, -inf }
 0x581   : > { %1357 = vmax.xlane.f32.xlu1 %v1356_v44  ;;  %v1344_v46 = vpop.f32.mrf.mxu1 }
 0x582   : > { %v1353_v47 = vsel %vm752_vm2, %v1344_v46, -inf }
 0x583   : > { %1354 = vmax.xlane.f32.xlu0 %v1353_v47 }
 0x585   : > { %769 = vadd.xlane.f32.xlu1 %v768_v49  ;;  %v1976_v49 = vld [vmem:[%s2745_s7] ss:$0 sm:$0xff] }
 0x587   : > { %766 = vadd.xlane.f32.xlu0 %v765_v51 }
 0x589   : > { %969 = vadd.xlane.f32.xlu1 %v968_v53 }
 0x58b   : > { %966 = vadd.xlane.f32.xlu0 %v965_v54 }
 0x59a   : > { %775 = vrot.lane.b32.xlu1 %v2528_v42, %s2347_s15 }
 0x59e   : > { %977 = vrot.lane.b32.xlu1 %v2526_v40, %s2348_s17 }
 0x5a1   : > { %777 = vrot.lane.b32.xlu0 %v2526_v40, %s2347_s15 }
 0x5a2   : > { %975 = vrot.lane.b32.xlu1 %v2528_v42, %s2348_s17 }
 0x60a   : > { %v1358_v55 = vpop.xlane.xlu1 %1357 }
 0x60b   : > { %v1360_v56 = vsub.f32 %v2117_v43, %v1358_v55 }
 0x60c   : > { %v1355_v57 = vpop.xlane.xlu0 %1354 }
 0x60d   : > { %v1363_v58 = vmul.f32 1.442695, %v1360_v56  ;;  %v1359_v59 = vsub.f32 %v1344_v46, %v1355_v57 }
 0x60e   : > { %v770_v60 = vpop.xlane.xlu1 %769 }
 0x60f   : > { %2245 = vpow2.f32 %v1363_v58  ;;  %v1361_v61 = vmul.f32 1.442695, %v1359_v59 }
 0x610   : > { %2247 = vrcp.f32 %v770_v60  ;;  %v767_v62 = vpop.xlane.xlu0 %766 }
 0x611   : > { %2249 = vpow2.f32 %v1361_v61 }
 0x612   : > { %2251 = vrcp.f32 %v767_v62  ;;  %v970_v63 = vpop.xlane.xlu1 %969 }
 0x613   : > { %2253 = vrcp.f32 %v970_v63 }
 0x614   : > { %v967_v0 = vpop.xlane.xlu0 %966 }
 0x615   : > { %2255 = vrcp.f32 %v967_v0 }
 0x616   : > { %v776_v1 = vpop.permute.xlu1 %775 }
 0x618   : > { %v778_v2 = vpop.permute.xlu0 %777 }
 0x619   : > { %2076 = vmatprep.subr.mxu0 %v778_v2 }
 0x61a   : > { %2077 = vmatpush3.msra.mxu0 %v778_v2  ;;  %v978_v6 = vpop.permute.xlu1 %977  ;;  %v1634_v2 = vld [vmem:[%s2748_s10 + $0x18] sm:$0xff] }
 0x61b   : > { %2078 = vmatprep.subr.mxu0 %v776_v1  ;;  %2136 = vmatprep.subr.mxu1 %v1634_v2 }
 0x61c   : > { %v2246_v4 = vpop.eup %2245  ;;  %2079 = vmatpush3.msra.mxu0 %v776_v1  ;;  %2137 = vmatpush3.msra.mxu1 %v1634_v2 }
 0x61d   : > { %v2248_v7 = vpop.eup %2247  ;;  %2090 = vmatprep.subr.mxu0 %v978_v6  ;;  %v1368_v8 = vsel %vm752_vm2, %v2246_v4, 0.0 }
 0x61e   : > { %v2250_v9 = vpop.eup %2249  ;;  %1369 = vadd.xlane.f32.xlu1 %v1368_v8  ;;  %v774_v14 = vmul.f32 %v2248_v7, %v2238_v45  ;;  %v976_v17 = vpop.permute.xlu1 %975  ;;  %v1631_v7 = vld [vmem:[%s2748_s10] sm:$0xff] }
 0x61f   : > { %v2252_v10 = vpop.eup %2251  ;;  %v1365_v11 = vsel %vm752_vm2, %v2250_v9, 0.0 }
 0x620   : > { %1366 = vadd.xlane.f32.xlu0 %v1365_v11  ;;  %v772_v12 = vmul.f32 %v2252_v10, %v2240_v48  ;;  %v2254_v13 = vpop.eup %2253 }
 0x621   : > { %v974_v18 = vmul.f32 %v2254_v13, %v2242_v50 }
 0x622   : > { %v2256_v15 = vpop.eup %2255  ;;  %2080 = vmatprep.mubr.msk.f32.mxu0 %vm752_vm2, %v772_v12 }
 0x623   : > { %2081 = vmatmul.mubr.msk.f32.vlgmr.msra.gmra.mxu0 %vm752_vm2, %v774_v14  ;;  %v972_v16 = vmul.f32 %v2256_v15, %v2244_v52  ;;  %v1979_v15 = vld [vmem:[%s2746_s8] ss:$0 sm:$0xff] }
 0x624   : > { %2091 = vmatpush3.msra.mxu0 %v978_v6  ;;  %v1632_v6 = vld [vmem:[%s2748_s10 + $0x8] sm:$0xff] }
 0x625   : > { %2092 = vmatprep.subr.mxu0 %v976_v17  ;;  %2094 = vmatprep.mubr.msk.f32.mxu0 %vm752_vm2, %v972_v16 }
 0x626   : > { %2093 = vmatpush3.msra.mxu0 %v976_v17  ;;  %v1980_v17 = vld [vmem:[%s2747_s9] ss:$0 sm:$0xff] }
 0x627   : > { %2095 = vmatmul.mubr.msk.f32.vlgmr.msra.gmra.mxu0 %vm752_vm2, %v974_v18 }
 0x62f   : > { %1375 = vrot.lane.b32.xlu1 %v2528_v42, %s2349_s18 }
 0x636   : > { %1377 = vrot.lane.b32.xlu0 %v2526_v40, %s2349_s18 }
 0x6a7   : > { %v1370_v19 = vpop.xlane.xlu1 %1369 }
 0x6a8   : > { %2257 = vrcp.f32 %v1370_v19 }
 0x6a9   : > { %v1367_v20 = vpop.xlane.xlu0 %1366 }
 0x6aa   : > { %2259 = vrcp.f32 %v1367_v20 }
 0x6ab   : > { %v1376_v22 = vpop.permute.xlu1 %1375 }
 0x6ad   : > { %v1378_v21 = vpop.permute.xlu0 %1377 }
 0x6ae   : > { %2118 = vmatprep.subr.mxu0 %v1378_v21 }
 0x6af   : > { %2119 = vmatpush3.msra.mxu0 %v1378_v21 }
 0x6b0   : > { %2120 = vmatprep.subr.mxu0 %v1376_v22 }
 0x6b1   : > { %2121 = vmatpush3.msra.mxu0 %v1376_v22 }
 0x6b2   : > { %2125 = vmatprep.subr.mxu0 %v1496_v29 }
 0x6b5   : > { %v2258_v23 = vpop.eup %2257 }
 0x6b6   : > { %v1374_v26 = vmul.f32 %v2258_v23, %v2246_v4  ;;  %v1633_v4 = vld [vmem:[%s2748_s10 + $0x10] sm:$0xff] }
 0x6b7   : > { %v2260_v24 = vpop.eup %2259  ;;  %2138 = vmatprep.subr.mxu1 %v1633_v4 }
 0x6b8   : > { %v1372_v25 = vmul.f32 %v2260_v24, %v2250_v9  ;;  %2139 = vmatpush3.msra.mxu1 %v1633_v4  ;;  %v1756_v24 = vld [vmem:[%s2750_s12 + $0x78] sm:$0xff] }
 0x6b9   : > { %2140 = vmatprep.subr.mxu1 %v1632_v6 }
 0x6ba   : > { %2122 = vmatprep.mubr.msk.f32.mxu0 %vm752_vm2, %v1372_v25  ;;  %2141 = vmatpush3.msra.mxu1 %v1632_v6  ;;  %v1755_v25 = vld [vmem:[%s2750_s12 + $0x70] sm:$0xff] }
 0x6bb   : > { %2123 = vmatmul.mubr.msk.f32.vlgmr.msra.gmra.mxu0 %vm752_vm2, %v1374_v26  ;;  %2142 = vmatprep.subr.mxu1 %v1631_v7  ;;  %v1754_v26 = vld [vmem:[%s2750_s12 + $0x68] sm:$0xff] }
 0x6bc   : > { %2126 = vmatpush3.msra.mxu0 %v1496_v29  ;;  %2143 = vmatpush3.msra.mxu1 %v1631_v7  ;;  %v1749_v29 = vld [vmem:[%s2750_s12 + $0x40] sm:$0xff] }
 0x6bd   : > { %2127 = vmatprep.subr.mxu0 %v1495_v30 }
 0x6be   : > { %2128 = vmatpush3.msra.mxu0 %v1495_v30  ;;  %v1748_v30 = vld [vmem:[%s2750_s12 + $0x38] sm:$0xff] }
 0x6bf   : > { %2129 = vmatprep.subr.mxu0 %v1494_v31 }
 0x6c0   : > { %2130 = vmatpush3.msra.mxu0 %v1494_v31  ;;  %v1747_v31 = vld [vmem:[%s2750_s12 + $0x30] sm:$0xff] }
 0x6c1   : > { %2131 = vmatprep.subr.mxu0 %v1493_v32 }
 0x6c2   : > { %2132 = vmatpush3.msra.mxu0 %v1493_v32  ;;  %v1746_v32 = vld [vmem:[%s2750_s12 + $0x28] sm:$0xff] }
 0x6c3   : > { %2147 = vmatprep.subr.mxu0 %v1756_v24 }
 0x6e3   : > { %v2082_v42 = vpop.f32.mrf.mxu0 }
 0x6e5   : > { %v853_v40 = vpop.f32.mrf.mxu0 }
 0x6e7   : > { %v2096_v27 = vpop.f32.mrf.mxu0 }
 0x6e8   : > { %1466 = vrot.lane.b32.xlu1 %v2096_v27, %s2350_s19  ;;  %v1751_v27 = vld [vmem:[%s2750_s12 + $0x50] sm:$0xff] }
 0x6e9   : > { %v1053_v28 = vpop.f32.mrf.mxu0 }
 0x6ea   : > { %1464 = vrot.lane.b32.xlu0 %v1053_v28, %s2350_s19  ;;  %v1750_v28 = vld [vmem:[%s2750_s12 + $0x48] sm:$0xff] }
 0x6ec   : > { %1474 = vrot.lane.b32.xlu1 %v2598_v39, %s2351_s20 }
 0x6ee   : > { %1472 = vrot.lane.b32.xlu0 %v2600_v41, %s2351_s20 }
 0x75a   : > { %v1467_v35 = vpop.permute.xlu1 %1466 }
 0x75b   : > { %v1487_v43 = vsel %vm666_vm1, %v2082_v42, %v1467_v35  ;;  %v1753_v42 = vld [vmem:[%s2750_s12 + $0x60] sm:$0xff]  ;;  %v1743_v35 = vld [vmem:[%s2750_s12 + $0x10] sm:$0xff] }
 0x75c   : > { %v1465_v36 = vpop.permute.xlu0 %1464 }
 0x75d   : > { %v1486_v39 = vsel %vm666_vm1, %v853_v40, %v1465_v36  ;;  %v1752_v40 = vld [vmem:[%s2750_s12 + $0x58] sm:$0xff]  ;;  %v1742_v36 = vld [vmem:[%s2750_s12 + $0x8] sm:$0xff] }
 0x75e   : > { %v1475_v37 = vpop.permute.xlu1 %1474 }
 0x75f   : > { %v1489_v46 = vsel %vm752_vm2, %v1487_v43, %v1475_v37  ;;  %v1741_v37 = vld [vmem:[%s2750_s12] sm:$0xff] }
 0x760   : > { %v1473_v38 = vpop.permute.xlu0 %1472 }
 0x761   : > { %v1488_v44 = vsel %vm752_vm2, %v1486_v39, %v1473_v38  ;;  %v1981_v38 = vld [vmem:[#allocation2] ss:$0 sm:$0xff] }
 0x77b   : > { %v2124_v33 = vpop.f32.mrf.mxu0 }
 0x77c   : > { %1482 = vrot.lane.b32.xlu1 %v2124_v33, %s2352_s28  ;;  %v1745_v33 = vld [vmem:[%s2750_s12 + $0x20] sm:$0xff] }
 0x77d   : > { %v1453_v34 = vpop.f32.mrf.mxu0 }
 0x77e   : > { %1480 = vrot.lane.b32.xlu0 %v1453_v34, %s2352_s28  ;;  %v1744_v34 = vld [vmem:[%s2750_s12 + $0x18] sm:$0xff] }
 0x7ee   : > { %v1483_v41 = vpop.permute.xlu1 %1482 }
 0x7ef   : > { %v1492_v48 = vsel %vm1490_vm3, %v1489_v46, %v1483_v41 }
 0x7f0   : > { %v1481_v45 = vpop.permute.xlu0 %1480 }
 0x7f1   : > { %v1491_v47 = vsel %vm1490_vm3, %v1488_v44, %v1481_v45 }
 0x7f2   : > { %2133 = vmatprep.mubr.msk.f32.mxu0 %vm522_vm0, %v1491_v47 }
 0x7f3   : > { %2134 = vmatmul.mubr.msk.f32.vlgmr.msra.gmra.mxu0 %vm522_vm0, %v1492_v48 }
 0x7f4   : > { %2148 = vmatpush3.msra.mxu0 %v1756_v24 }
 0x7f5   : > { %2149 = vmatprep.subr.mxu0 %v1755_v25 }
 0x7f6   : > { %2150 = vmatpush3.msra.mxu0 %v1755_v25 }
 0x7f7   : > { %2151 = vmatprep.subr.mxu0 %v1754_v26 }
 0x7f8   : > { %2152 = vmatpush3.msra.mxu0 %v1754_v26 }
 0x7f9   : > { %2153 = vmatprep.subr.mxu0 %v1753_v42 }
 0x7fa   : > { %2154 = vmatpush3.msra.mxu0 %v1753_v42 }
 0x7fb   : > { %2155 = vmatprep.subr.mxu0 %v1752_v40 }
 0x7fc   : > { %2156 = vmatpush3.msra.mxu0 %v1752_v40 }
 0x7fd   : > { %2157 = vmatprep.subr.mxu0 %v1751_v27 }
 0x7fe   : > { %2158 = vmatpush3.msra.mxu0 %v1751_v27 }
 0x7ff   : > { %2159 = vmatprep.subr.mxu0 %v1750_v28 }
 0x800   : > { %2160 = vmatpush3.msra.mxu0 %v1750_v28 }
 0x801   : > { %2161 = vmatprep.subr.mxu0 %v1749_v29 }
 0x802   : > { %2162 = vmatpush3.msra.mxu0 %v1749_v29 }
 0x803   : > { %2163 = vmatprep.subr.mxu0 %v1748_v30 }
 0x804   : > { %2164 = vmatpush3.msra.mxu0 %v1748_v30 }
 0x805   : > { %2165 = vmatprep.subr.mxu0 %v1747_v31 }
 0x806   : > { %2166 = vmatpush3.msra.mxu0 %v1747_v31 }
 0x807   : > { %2167 = vmatprep.subr.mxu0 %v1746_v32 }
 0x808   : > { %2168 = vmatpush3.msra.mxu0 %v1746_v32 }
 0x809   : > { %2169 = vmatprep.subr.mxu0 %v1745_v33 }
 0x80a   : > { %2170 = vmatpush3.msra.mxu0 %v1745_v33 }
 0x80b   : > { %2171 = vmatprep.subr.mxu0 %v1744_v34 }
 0x80c   : > { %2172 = vmatpush3.msra.mxu0 %v1744_v34 }
 0x80d   : > { %2173 = vmatprep.subr.mxu0 %v1743_v35 }
 0x80e   : > { %2174 = vmatpush3.msra.mxu0 %v1743_v35 }
 0x80f   : > { %2175 = vmatprep.subr.mxu0 %v1742_v36 }
 0x810   : > { %2176 = vmatpush3.msra.mxu0 %v1742_v36 }
 0x811   : > { %2177 = vmatprep.subr.mxu0 %v1741_v37 }
 0x812   : > { %2178 = vmatpush3.msra.mxu0 %v1741_v37 }
 0x8b3   : > { %v2135_v50 = vpop.f32.mrf.mxu0 }
 0x8b4   : > { %v1582_v51 = vadd.f32 %v2135_v50, %v1976_v49 }
 0x8b5   : > { %v1576_v52 = vpop.f32.mrf.mxu0 }
 0x8b6   : > { %v2646_v53 = vadd.f32 %v1582_v51, %v2493_v5  ;;  %v1577_v54 = vadd.f32 %v1976_v49, %v1576_v52 }
 0x8b8   : > { %v2649_v55 = vadd.f32 %v1577_v54, %v2491_v3  ;;  %v1592_v56 = vsel %vm522_vm0, %v2646_v53, 0.0 }
 0x8b9   : > { %1593 = vadd.xlane.f32.xlu1 %v1592_v56 }
 0x8ba   : > { %v1589_v57 = vsel %vm522_vm0, %v2649_v55, 0.0 }
 0x8bb   : > { %1590 = vadd.xlane.f32.xlu0 %v1589_v57 }
 0x942   : > { %v1594_v58 = vpop.xlane.xlu1 %1593 }
 0x943   : > { %v1596_v59 = vmul.f32 0.03125, %v1594_v58 }
 0x944   : > { %v1591_v60 = vpop.xlane.xlu0 %1590 }
 0x945   : > { %v1595_v61 = vmul.f32 0.03125, %v1591_v60  ;;  %v1598_v62 = vsub.f32 %v2646_v53, %v1596_v59 }
 0x947   : > { %v1597_v5 = vsub.f32 %v2649_v55, %v1595_v61  ;;  %v1600_v0 = vmul.f32 %v1598_v62, %v1598_v62 }
 0x949   : > { %v1599_v63 = vmul.f32 %v1597_v5, %v1597_v5  ;;  %v1604_v1 = vsel %vm522_vm0, %v1600_v0, 0.0 }
 0x94b   : > { %v1601_v3 = vsel %vm522_vm0, %v1599_v63, 0.0 }
 0x94c   : > { %1602 = vadd.xlane.f32.xlu0 %v1601_v3  ;;  %v1984_v3 = vld [vmem:[#allocation4] ss:$0 sm:$0xff] }
 0x950   : > { %1605 = vadd.xlane.f32.xlu0 %v1604_v1 }
 0x9d5   : > { %v1603_v8 = vpop.xlane.xlu0 %1602 }
 0x9d6   : > { %v1607_v9 = vmul.f32 0.03125, %v1603_v8 }
 0x9d8   : > { %v1609_v10 = vadd.f32 1e-05, %v1607_v9 }
 0x9d9   : > { %v1606_v11 = vpop.xlane.xlu0 %1605 }
 0x9da   : > { %2261 = vrsqrt.f32 %v1609_v10  ;;  %v1608_v12 = vmul.f32 0.03125, %v1606_v11 }
 0x9dc   : > { %v1610_v13 = vadd.f32 1e-05, %v1608_v12 }
 0x9de   : > { %2263 = vrsqrt.f32 %v1610_v13 }
 0x9e7   : > { %v2262_v14 = vpop.eup %2261 }
 0x9e8   : > { %v1613_v16 = vmul.f32 %v2262_v14, %v1597_v5 }
 0x9ea   : > { %v1621_v18 = vmul.f32 %v1979_v15, %v1613_v16 }
 0x9eb   : > { %v2264_v19 = vpop.eup %2263 }
 0x9ec   : > { %v1614_v20 = vmul.f32 %v2264_v19, %v1598_v62  ;;  %v1629_v21 = vadd.f32 %v1980_v17, %v1621_v18 }
 0x9ee   : > { %v1622_v22 = vmul.f32 %v1979_v15, %v1614_v20  ;;  %2144 = vmatprep.mubr.msk.f32.mxu1 %vm522_vm0, %v1629_v21 }
 0x9f0   : > { %v1630_v23 = vadd.f32 %v1980_v17, %v1622_v22 }
 0x9f2   : > { %2145 = vmatmul.mubr.msk.f32.vlgmr.msra.gmra.mxu1 %vm522_vm0, %v1630_v23 }
 0xab2   : > { %v2146_v39 = vpop.f32.mrf.mxu1 }
 0xab3   : > { %v1720_v41 = vadd.f32 %v2146_v39, %v1981_v38 }
 0xab4   : > { %v1714_v43 = vpop.f32.mrf.mxu1 }
 0xab5   : > { %v1726_v44 = vmul.f32 0.044715, %v1720_v41  ;;  %v1715_v45 = vadd.f32 %v1981_v38, %v1714_v43  ;;  %v1724_v62 = vmul.f32 0.5, %v1720_v41 }
 0xab7   : > { %v1728_v46 = vmul.f32 %v1726_v44, %v1720_v41  ;;  %v1725_v47 = vmul.f32 0.044715, %v1715_v45  ;;  %v1723_v60 = vmul.f32 0.5, %v1715_v45 }
 0xab9   : > { %v1730_v48 = vmul.f32 %v1728_v46, %v1720_v41  ;;  %v1727_v49 = vmul.f32 %v1725_v47, %v1715_v45 }
 0xabb   : > { %v1732_v50 = vadd.f32 %v1730_v48, %v1720_v41  ;;  %v1729_v51 = vmul.f32 %v1727_v49, %v1715_v45 }
 0xabd   : > { %v1731_v52 = vadd.f32 %v1729_v51, %v1715_v45  ;;  %v1734_v54 = vmul.f32 0.7978846, %v1732_v50 }
 0xabf   : > { %v1733_v56 = vmul.f32 0.7978846, %v1731_v52  ;;  %2265 = vtanh.f32 %v1734_v54 }
 0xac1   : > { %2267 = vtanh.f32 %v1733_v56 }
 0xacc   : > { %v2266_v57 = vpop.eup %2265 }
 0xacd   : > { %v1738_v59 = vadd.f32 1.0, %v2266_v57 }
 0xace   : > { %v2268_v58 = vpop.eup %2267 }
 0xacf   : > { %v1737_v61 = vadd.f32 1.0, %v2268_v58  ;;  %v1740_v63 = vmul.f32 %v1738_v59, %v1724_v62 }
 0xad1   : > { %v1739_v5 = vmul.f32 %v1737_v61, %v1723_v60 }
 0xad3   : > { %2179 = vmatprep.mubr.f32.mxu0 %v1739_v5 }
 0xad4   : > { %2180 = vmatmul.mubr.f32.vlgmr.msra.gmra.mxu0 %v1740_v63 }
 0xb94   : > { %v2181_v0 = vpop.f32.mrf.mxu0 }
 0xb95   : > { %v1836_v1 = vadd.f32 %v2181_v0, %v1984_v3 }
 0xb96   : > { %v1830_v2 = vpop.f32.mrf.mxu0 }
 0xb97   : > { %v1840_v4 = vadd.f32 %v1836_v1, %v2646_v53  ;;  %v1831_v6 = vadd.f32 %v1984_v3, %v1830_v2 }
 0xb99   : > { %1842 = vst.msk [vmem:[%s513_s30 + $0x8] sm:$0xff] %vm522_vm0, %v1840_v4  ;;  %v1839_v7 = vadd.f32 %v1831_v6, %v2649_v55 }
 0xb9b   : > { %1841 = vst.msk [vmem:[%s513_s30] sm:$0xff] %vm522_vm0, %v1839_v7 }
 0xb9c PF: > { %s26_s29 = sadd.s32 1, %s2335_s29  }
 0xb9d   : > { %p23_p3 = scmp.ge.s32.totalorder %s26_s29, 4  }
 0xb9f   :  { %25 = sbr.rel (!%p23_p3) target bundleno = 2 (0x2), region = 118 }
 0xba4   :  { %1864 = vsyncpa [#allocation3], 1 }
 0xba5   :  { %1866 = vsyncpa [#allocation3 + $0x1], 1 }
 0xba6   :  { %1867 = vsyncpa [#allocation5], 1 }

</bundles_post_ra>
